<compile_context>
chip_gen: v6e
topology: v6e:2x2x1
jax: 0.10.0
libtpu: 0.0.40
codegen_flags: <defaults>
</compile_context>

<pallas_src>
import numpy as np
import jax
import jax.numpy as jnp
from jax import lax
from jax.experimental import pallas as pl
from jax.experimental.pallas import tpu as pltpu

NUM_CLASSES = 20   # CDGNet (LIP) uses 20 classes; the flip remap needs >= 20
HIDDEN = 32

# channel permutation from the PyTorch loop: swap (14,15), (16,17), (18,19)
_FLIP_PERM = list(range(14)) + [15, 14, 17, 16, 19, 18]

_VMEM_LIMIT = 64 * 1024 * 1024


# --------------------------------------------------------------------------
# Kernel 1: synthetic backbone head, (C, M)-layout:
#   out = W2^T @ relu(W1^T @ x + b1) + b2        x: (K, TILE_M)
# Output last dim is the flattened spatial tile -> lane-dense stores.
# --------------------------------------------------------------------------
def _head_kernel(x_ref, w1t_ref, b1t_ref, w2t_ref, b2t_ref, o_ref):
    x = x_ref[0]                                                     # (K, TILE_M)
    h = jnp.dot(w1t_ref[...], x, preferred_element_type=jnp.float32) + b1t_ref[...]
    h = jnp.maximum(h, 0.0)                                          # (HIDDEN, TILE_M)
    o = jnp.dot(w2t_ref[...], h, preferred_element_type=jnp.float32) + b2t_ref[...]
    o_ref[0] = o                                                     # (C, TILE_M)


def _run_head(x, w1, b1, w2, b2):
    """x: (n2, K, M) patches.  Returns logits (n2, C, M) in NCHW-friendly layout."""
    n2, k, m = x.shape
    hidden = w1.shape[1]
    c = w2.shape[1]

    # Row tiling over the flattened spatial dim.  At real resolutions TILE_M is a
    # multiple of 128 (lane-dense, pipelined); at toy sizes a single full tile.
    if m <= 2048:
        tile_m, mp = m, m
    else:
        tile_m = 2048
        mp = ((m + tile_m - 1) // tile_m) * tile_m
        x = jnp.pad(x, ((0, 0), (0, 0), (0, mp - m)))

    w1t = jnp.asarray(w1).T                     # (HIDDEN, K)
    b1t = jnp.asarray(b1).reshape(hidden, 1)    # (HIDDEN, 1)
    w2t = jnp.asarray(w2).T                     # (C, HIDDEN)
    b2t = jnp.asarray(b2).reshape(c, 1)         # (C, 1)

    out = pl.pallas_call(
        _head_kernel,
        out_shape=jax.ShapeDtypeStruct((n2, c, mp), jnp.float32),
        grid_spec=pltpu.PrefetchScalarGridSpec(
            num_scalar_prefetch=0,
            grid=(n2, mp // tile_m),
            in_specs=[
                pl.BlockSpec((1, k, tile_m), lambda n, t: (n, 0, t)),
                pl.BlockSpec((hidden, k), lambda n, t: (0, 0)),
                pl.BlockSpec((hidden, 1), lambda n, t: (0, 0)),
                pl.BlockSpec((c, hidden), lambda n, t: (0, 0)),
                pl.BlockSpec((c, 1), lambda n, t: (0, 0)),
            ],
            out_specs=pl.BlockSpec((1, c, tile_m), lambda n, t: (n, 0, t)),
        ),
        compiler_params=pltpu.CompilerParams(
            dimension_semantics=("parallel", "parallel"),
            vmem_limit_bytes=_VMEM_LIMIT),
    )(x, w1t, b1t, w2t, b2t)
    return out[:, :, :m]


# --------------------------------------------------------------------------
# Kernel 2: bilinear upsample (align_corners=True) + CDGNet flip fusion.
#   out[n, c] = (0.5*A_h) @ ( F[n, c] @ A_w^T  +  F[n, perm(c)] @ A_w_rev^T )
# All channels of a sample are resident, so the channel permutation is a
# static in-VMEM index and feat is streamed from HBM exactly once.
# --------------------------------------------------------------------------
def _fuse_kernel(f_ref, ah_ref, awt_ref, awrt_ref, o_ref):
    f = f_ref[0]                                                     # (C, Hs, Ws)
    ah = ah_ref[...]                                                 # (TILE_H, Hs), 0.5 folded in
    awt = awt_ref[...]                                               # (Ws, W)
    awrt = awrt_ref[...]                                             # (Ws, W), W-flip folded in
    for c in range(NUM_CLASSES):
        t = (jnp.dot(f[c], awt, preferred_element_type=jnp.float32)
             + jnp.dot(f[_FLIP_PERM[c]], awrt, preferred_element_type=jnp.float32))
        o_ref[0, c] = jnp.dot(ah, t, preferred_element_type=jnp.float32)


def _pick_h_tile(h, cap=256):
    """Largest divisor of h that is <= cap and 8-aligned; else the full extent.
    Shrink `cap` on 64 MiB-VMEM parts (v7x) to keep the output block double-buffered."""
    if h <= cap:
        return h
    for t in range(cap, 0, -1):
        if h % t == 0 and t % 8 == 0:
            return t
    return h


def _run_fuse(feat, a_h, awt, awrt):
    n2, c, hs, ws = feat.shape
    H = a_h.shape[0]
    W = awt.shape[1]
    tile_h = _pick_h_tile(H)
    return pl.pallas_call(
        _fuse_kernel,
        out_shape=jax.ShapeDtypeStruct((n2, c, H, W), jnp.float32),
        grid_spec=pltpu.PrefetchScalarGridSpec(
            num_scalar_prefetch=0,
            grid=(n2, H // tile_h),
            in_specs=[
                pl.BlockSpec((1, c, hs, ws), lambda n, h: (n, 0, 0, 0)),
                pl.BlockSpec((tile_h, hs), lambda n, h: (h, 0)),
                pl.BlockSpec((ws, W), lambda n, h: (0, 0)),
                pl.BlockSpec((ws, W), lambda n, h: (0, 0)),
            ],
            out_specs=pl.BlockSpec((1, c, tile_h, W), lambda n, h: (n, 0, h, 0)),
        ),
        compiler_params=pltpu.CompilerParams(
            dimension_semantics=("parallel", "parallel"),
            vmem_limit_bytes=_VMEM_LIMIT),
    )(feat, a_h, awt, awrt)


# --------------------------------------------------------------------------
# Helpers (plain JAX / numpy glue)
# --------------------------------------------------------------------------
def _bilinear_matrix(out_size, in_size):
    """Interpolation matrix matching torch Upsample(mode='bilinear', align_corners=True)."""
    A = np.zeros((out_size, in_size), np.float32)
    if out_size == 1 or in_size == 1:
        A[:, 0] = 1.0
        return A
    scale = (in_size - 1) / (out_size - 1)
    for i in range(out_size):
        src = i * scale
        lo = int(np.floor(src))
        hi = min(lo + 1, in_size - 1)
        frac = src - lo
        A[i, lo] += 1.0 - frac
        A[i, hi] += frac
    return A


def cdgnet_forward(image, params):
    """image: (B, 3, H, W) float32  ->  output: (2B, H, W, num_classes)."""
    w1, b1, w2, b2 = params
    B, Cin, H, W = image.shape

    # --- test-time flip augmentation (glue) ---
    fused = jnp.concatenate([image, jnp.flip(image, axis=-1)], axis=0)   # (2B,3,H,W)

    # --- im2col for the 3x3 stride-2 "backbone" conv (glue) ---
    patches = lax.conv_general_dilated_patches(
        fused, filter_shape=(3, 3), window_strides=(2, 2),
        padding=((1, 1), (1, 1)))                                        # (2B, 9*Cin, Hs, Ws)
    n2, k, hs, ws = patches.shape
    x = patches.reshape(n2, k, hs * ws)                                  # free reshape, NCHW kept

    # --- Pallas: matmul + ReLU + matmul head, (C, M) layout ---
    feat = _run_head(x, w1, b1, w2, b2).reshape(n2, NUM_CLASSES, hs, ws)  # (2B,C,Hs,Ws)

    # --- bilinear (align_corners=True) upsample matrices (glue).  The 0.5
    #     flip-average factor is folded into A_h; the W-flip into A_w_rev. ---
    a_h = jnp.asarray((0.5 * _bilinear_matrix(H, hs)).astype(np.float32))     # (H, Hs)
    a_w = _bilinear_matrix(W, ws)                                             # (W, Ws)
    awt = jnp.asarray(np.ascontiguousarray(a_w.T))                            # (Ws, W)
    awrt = jnp.asarray(np.ascontiguousarray(a_w[::-1, :].T))                  # (Ws, W)

    # --- Pallas: upsample + channel-swap + W-flip + average ---
    out_nchw = _run_fuse(feat, a_h, awt, awrt)                           # (2B,C,H,W)
    return out_nchw.transpose(0, 2, 3, 1)                                # (2B,H,W,C)


def _pure_jax_reference(image, params):
    w1, b1, w2, b2 = params
    B, Cin, H, W = image.shape
    fused = jnp.concatenate([image, jnp.flip(image, axis=-1)], axis=0)
    patches = lax.conv_general_dilated_patches(
        fused, (3, 3), (2, 2), ((1, 1), (1, 1)))
    n2, k, hs, ws = patches.shape
    x = patches.transpose(0, 2, 3, 1).reshape(-1, k)
    h = jnp.maximum(x @ w1 + b1, 0.0)
    logits = (h @ w2 + b2).reshape(n2, hs, ws, NUM_CLASSES).transpose(0, 3, 1, 2)
    a_h = jnp.asarray(_bilinear_matrix(H, hs))
    a_w = jnp.asarray(_bilinear_matrix(W, ws))
    up = jnp.einsum('hi,ncij,wj->nchw', a_h, logits, a_w)
    pred = up.transpose(0, 2, 3, 1)                       # (2B, H, W, C)  NHWC
    perm = np.asarray(_FLIP_PERM, np.int32)
    pred_flip = jnp.flip(pred[..., perm], axis=2)
    return 0.5 * (pred + pred_flip)


if __name__ == "__main__":
    key = jax.random.PRNGKey(0)
    k_img, k_w1, k_b1, k_w2, k_b2 = jax.random.split(key, 5)

    B, Cin, H, W = 2, 3, 16, 16
    image = jax.random.normal(k_img, (B, Cin, H, W), jnp.float32)

    K = Cin * 3 * 3
    w1 = 0.1 * jax.random.normal(k_w1, (K, HIDDEN), jnp.float32)
    b1 = 0.01 * jax.random.normal(k_b1, (1, HIDDEN), jnp.float32)
    w2 = 0.1 * jax.random.normal(k_w2, (HIDDEN, NUM_CLASSES), jnp.float32)
    b2 = 0.01 * jax.random.normal(k_b2, (1, NUM_CLASSES), jnp.float32)
    params = (w1, b1, w2, b2)

    out = jax.jit(cdgnet_forward)(image, params)
    out = jax.block_until_ready(out)

    ref = jax.block_until_ready(_pure_jax_reference(image, params))
    assert out.shape == (2 * B, H, W, NUM_CLASSES), out.shape
    np.testing.assert_allclose(np.asarray(out), np.asarray(ref), rtol=1e-2, atol=1e-2)

    print("KERNEL_OK")
</pallas_src>

<mosaic_0001>
module attributes {stable_mosaic.version = 11 : i64} {
  func.func @_head_kernel(%arg0: i32, %arg1: i32, %arg2: memref<1x27x64xf32, #tpu.memory_space<vmem>>, %arg3: memref<32x27xf32, #tpu.memory_space<vmem>>, %arg4: memref<32x1xf32, #tpu.memory_space<vmem>>, %arg5: memref<20x32xf32, #tpu.memory_space<vmem>>, %arg6: memref<20x1xf32, #tpu.memory_space<vmem>>, %arg7: memref<1x20x64xf32, #tpu.memory_space<vmem>>) attributes {dimension_semantics = [#tpu.dimension_semantics<parallel>, #tpu.dimension_semantics<parallel>], iteration_bounds = array<i64: 4, 1>, scalar_prefetch = 0 : i64, scratch_operands = 0 : i64, tpu.core_type = #tpu.core_type<tc>, window_params = [{transform_indices = @transform_0, window_bounds = array<i64: 1, 27, 64>}, {pipeline_mode = #tpu.pipeline_mode<synchronous>, transform_indices = @transform_1, window_bounds = array<i64: 32, 27>}, {pipeline_mode = #tpu.pipeline_mode<synchronous>, transform_indices = @transform_2, window_bounds = array<i64: 32, 1>}, {pipeline_mode = #tpu.pipeline_mode<synchronous>, transform_indices = @transform_3, window_bounds = array<i64: 20, 32>}, {pipeline_mode = #tpu.pipeline_mode<synchronous>, transform_indices = @transform_4, window_bounds = array<i64: 20, 1>}, {transform_indices = @transform_5, window_bounds = array<i64: 1, 20, 64>}]} {
    %c0 = arith.constant 0 : index
    %c0_0 = arith.constant 0 : index
    %c0_1 = arith.constant 0 : index
    %0 = vector.load %arg2[%c0, %c0_0, %c0_1] : memref<1x27x64xf32, #tpu.memory_space<vmem>>, vector<1x27x64xf32>
    %1 = vector.shape_cast %0 : vector<1x27x64xf32> to vector<27x64xf32>
    %c0_2 = arith.constant 0 : index
    %c0_3 = arith.constant 0 : index
    %2 = vector.load %arg3[%c0_2, %c0_3] : memref<32x27xf32, #tpu.memory_space<vmem>>, vector<32x27xf32>
    %cst = arith.constant dense<0.000000e+00> : vector<32x64xf32>
    %3 = tpu.matmul %2, %1, %cst {dimension_numbers = #tpu.dot_dimension_numbers<[1], [0], [0], [1], [0, 0, 1, 1], [], []>} : vector<32x27xf32>, vector<27x64xf32>, vector<32x64xf32> -> vector<32x64xf32>
    %c0_4 = arith.constant 0 : index
    %c0_5 = arith.constant 0 : index
    %4 = vector.load %arg4[%c0_4, %c0_5] : memref<32x1xf32, #tpu.memory_space<vmem>>, vector<32x1xf32>
    %5 = vector.broadcast %4 : vector<32x1xf32> to vector<32x64xf32>
    %6 = arith.addf %3, %5 : vector<32x64xf32>
    %cst_6 = arith.constant 0.000000e+00 : f32
    %7 = vector.broadcast %cst_6 : f32 to vector<32x64xf32>
    %8 = arith.maximumf %6, %7 : vector<32x64xf32>
    %c0_7 = arith.constant 0 : index
    %c0_8 = arith.constant 0 : index
    %9 = vector.load %arg5[%c0_7, %c0_8] : memref<20x32xf32, #tpu.memory_space<vmem>>, vector<20x32xf32>
    %cst_9 = arith.constant dense<0.000000e+00> : vector<20x64xf32>
    %10 = tpu.matmul %9, %8, %cst_9 {dimension_numbers = #tpu.dot_dimension_numbers<[1], [0], [0], [1], [0, 0, 1, 1], [], []>} : vector<20x32xf32>, vector<32x64xf32>, vector<20x64xf32> -> vector<20x64xf32>
    %c0_10 = arith.constant 0 : index
    %c0_11 = arith.constant 0 : index
    %11 = vector.load %arg6[%c0_10, %c0_11] : memref<20x1xf32, #tpu.memory_space<vmem>>, vector<20x1xf32>
    %12 = vector.broadcast %11 : vector<20x1xf32> to vector<20x64xf32>
    %13 = arith.addf %10, %12 : vector<20x64xf32>
    %c0_12 = arith.constant 0 : index
    %c0_13 = arith.constant 0 : index
    %c0_14 = arith.constant 0 : index
    %14 = vector.load %arg7[%c0_12, %c0_13, %c0_14] : memref<1x20x64xf32, #tpu.memory_space<vmem>>, vector<1x20x64xf32>
    %15 = vector.shape_cast %14 : vector<1x20x64xf32> to vector<20x64xf32>
    %16 = vector.shape_cast %13 : vector<20x64xf32> to vector<1x20x64xf32>
    tpu.vector_store %arg7[%c0_12, %c0_13, %c0_14], %16 {strides = array<i32>} : memref<1x20x64xf32, #tpu.memory_space<vmem>>, vector<1x20x64xf32>,
    return
  }
  func.func @transform_0(%arg0: i32, %arg1: i32) -> (i32, i32, i32) {
    %c0_i32 = arith.constant 0 : i32
    %c0_i32_0 = arith.constant 0 : i32
    return %arg0, %c0_i32, %arg1 : i32, i32, i32
  }
  func.func @transform_1(%arg0: i32, %arg1: i32) -> (i32, i32) {
    %c0_i32 = arith.constant 0 : i32
    %c0_i32_0 = arith.constant 0 : i32
    %c0_i32_1 = arith.constant 0 : i32
    return %c0_i32, %c0_i32_0 : i32, i32
  }
  func.func @transform_2(%arg0: i32, %arg1: i32) -> (i32, i32) {
    %c0_i32 = arith.constant 0 : i32
    %c0_i32_0 = arith.constant 0 : i32
    %c0_i32_1 = arith.constant 0 : i32
    return %c0_i32, %c0_i32_0 : i32, i32
  }
  func.func @transform_3(%arg0: i32, %arg1: i32) -> (i32, i32) {
    %c0_i32 = arith.constant 0 : i32
    %c0_i32_0 = arith.constant 0 : i32
    %c0_i32_1 = arith.constant 0 : i32
    return %c0_i32, %c0_i32_0 : i32, i32
  }
  func.func @transform_4(%arg0: i32, %arg1: i32) -> (i32, i32) {
    %c0_i32 = arith.constant 0 : i32
    %c0_i32_0 = arith.constant 0 : i32
    %c0_i32_1 = arith.constant 0 : i32
    return %c0_i32, %c0_i32_0 : i32, i32
  }
  func.func @transform_5(%arg0: i32, %arg1: i32) -> (i32, i32, i32) {
    %c0_i32 = arith.constant 0 : i32
    %c0_i32_0 = arith.constant 0 : i32
    return %arg0, %c0_i32, %arg1 : i32, i32, i32
  }
}

module attributes {stable_mosaic.version = 11 : i64} {
  func.func @_fuse_kernel(%arg0: i32, %arg1: i32, %arg2: memref<1x20x8x8xf32, #tpu.memory_space<vmem>>, %arg3: memref<16x8xf32, #tpu.memory_space<vmem>>, %arg4: memref<8x16xf32, #tpu.memory_space<vmem>>, %arg5: memref<8x16xf32, #tpu.memory_space<vmem>>, %arg6: memref<1x20x16x16xf32, #tpu.memory_space<vmem>>) attributes {dimension_semantics = [#tpu.dimension_semantics<parallel>, #tpu.dimension_semantics<parallel>], iteration_bounds = array<i64: 4, 1>, scalar_prefetch = 0 : i64, scratch_operands = 0 : i64, tpu.core_type = #tpu.core_type<tc>, window_params = [{transform_indices = @transform_0, window_bounds = array<i64: 1, 20, 8, 8>}, {transform_indices = @transform_1, window_bounds = array<i64: 16, 8>}, {pipeline_mode = #tpu.pipeline_mode<synchronous>, transform_indices = @transform_2, window_bounds = array<i64: 8, 16>}, {pipeline_mode = #tpu.pipeline_mode<synchronous>, transform_indices = @transform_3, window_bounds = array<i64: 8, 16>}, {transform_indices = @transform_4, window_bounds = array<i64: 1, 20, 16, 16>}]} {
    %c0 = arith.constant 0 : index
    %c0_0 = arith.constant 0 : index
    %c0_1 = arith.constant 0 : index
    %c0_2 = arith.constant 0 : index
    %0 = vector.load %arg2[%c0, %c0_0, %c0_1, %c0_2] : memref<1x20x8x8xf32, #tpu.memory_space<vmem>>, vector<1x20x8x8xf32>
    %1 = vector.shape_cast %0 : vector<1x20x8x8xf32> to vector<20x8x8xf32>
    %c0_3 = arith.constant 0 : index
    %c0_4 = arith.constant 0 : index
    %2 = vector.load %arg3[%c0_3, %c0_4] : memref<16x8xf32, #tpu.memory_space<vmem>>, vector<16x8xf32>
    %c0_5 = arith.constant 0 : index
    %c0_6 = arith.constant 0 : index
    %3 = vector.load %arg4[%c0_5, %c0_6] : memref<8x16xf32, #tpu.memory_space<vmem>>, vector<8x16xf32>
    %c0_7 = arith.constant 0 : index
    %c0_8 = arith.constant 0 : index
    %4 = vector.load %arg5[%c0_7, %c0_8] : memref<8x16xf32, #tpu.memory_space<vmem>>, vector<8x16xf32>
    %5 = vector.extract_strided_slice %1 {offsets = [0, 0, 0], sizes = [1, 8, 8], strides = [1, 1, 1]} : vector<20x8x8xf32> to vector<1x8x8xf32>
    %6 = vector.shape_cast %5 : vector<1x8x8xf32> to vector<8x8xf32>
    %cst = arith.constant dense<0.000000e+00> : vector<8x16xf32>
    %7 = tpu.matmul %6, %3, %cst {dimension_numbers = #tpu.dot_dimension_numbers<[1], [0], [0], [1], [0, 0, 1, 1], [], []>} : vector<8x8xf32>, vector<8x16xf32>, vector<8x16xf32> -> vector<8x16xf32>
    %8 = vector.extract_strided_slice %1 {offsets = [0, 0, 0], sizes = [1, 8, 8], strides = [1, 1, 1]} : vector<20x8x8xf32> to vector<1x8x8xf32>
    %9 = vector.shape_cast %8 : vector<1x8x8xf32> to vector<8x8xf32>
    %cst_9 = arith.constant dense<0.000000e+00> : vector<8x16xf32>
    %10 = tpu.matmul %9, %4, %cst_9 {dimension_numbers = #tpu.dot_dimension_numbers<[1], [0], [0], [1], [0, 0, 1, 1], [], []>} : vector<8x8xf32>, vector<8x16xf32>, vector<8x16xf32> -> vector<8x16xf32>
    %11 = arith.addf %7, %10 : vector<8x16xf32>
    %cst_10 = arith.constant dense<0.000000e+00> : vector<16x16xf32>
    %12 = tpu.matmul %2, %11, %cst_10 {dimension_numbers = #tpu.dot_dimension_numbers<[1], [0], [0], [1], [0, 0, 1, 1], [], []>} : vector<16x8xf32>, vector<8x16xf32>, vector<16x16xf32> -> vector<16x16xf32>
    %c0_11 = arith.constant 0 : index
    %c0_12 = arith.constant 0 : index
    %c0_13 = arith.constant 0 : index
    %c0_14 = arith.constant 0 : index
    %13 = vector.load %arg6[%c0_11, %c0_12, %c0_13, %c0_14] : memref<1x20x16x16xf32, #tpu.memory_space<vmem>>, vector<1x1x16x16xf32>
    %14 = vector.shape_cast %13 : vector<1x1x16x16xf32> to vector<16x16xf32>
    %15 = vector.shape_cast %12 : vector<16x16xf32> to vector<1x1x16x16xf32>
    tpu.vector_store %arg6[%c0_11, %c0_12, %c0_13, %c0_14], %15 {strides = array<i32>} : memref<1x20x16x16xf32, #tpu.memory_space<vmem>>, vector<1x1x16x16xf32>,
    %16 = vector.extract_strided_slice %1 {offsets = [1, 0, 0], sizes = [1, 8, 8], strides = [1, 1, 1]} : vector<20x8x8xf32> to vector<1x8x8xf32>
    %17 = vector.shape_cast %16 : vector<1x8x8xf32> to vector<8x8xf32>
    %cst_15 = arith.constant dense<0.000000e+00> : vector<8x16xf32>
    %18 = tpu.matmul %17, %3, %cst_15 {dimension_numbers = #tpu.dot_dimension_numbers<[1], [0], [0], [1], [0, 0, 1, 1], [], []>} : vector<8x8xf32>, vector<8x16xf32>, vector<8x16xf32> -> vector<8x16xf32>
    %19 = vector.extract_strided_slice %1 {offsets = [1, 0, 0], sizes = [1, 8, 8], strides = [1, 1, 1]} : vector<20x8x8xf32> to vector<1x8x8xf32>
    %20 = vector.shape_cast %19 : vector<1x8x8xf32> to vector<8x8xf32>
    %cst_16 = arith.constant dense<0.000000e+00> : vector<8x16xf32>
    %21 = tpu.matmul %20, %4, %cst_16 {dimension_numbers = #tpu.dot_dimension_numbers<[1], [0], [0], [1], [0, 0, 1, 1], [], []>} : vector<8x8xf32>, vector<8x16xf32>, vector<8x16xf32> -> vector<8x16xf32>
    %22 = arith.addf %18, %21 : vector<8x16xf32>
    %cst_17 = arith.constant dense<0.000000e+00> : vector<16x16xf32>
    %23 = tpu.matmul %2, %22, %cst_17 {dimension_numbers = #tpu.dot_dimension_numbers<[1], [0], [0], [1], [0, 0, 1, 1], [], []>} : vector<16x8xf32>, vector<8x16xf32>, vector<16x16xf32> -> vector<16x16xf32>
    %c0_18 = arith.constant 0 : index
    %c1 = arith.constant 1 : index
    %c0_19 = arith.constant 0 : index
    %c0_20 = arith.constant 0 : index
    %24 = vector.load %arg6[%c0_18, %c1, %c0_19, %c0_20] : memref<1x20x16x16xf32, #tpu.memory_space<vmem>>, vector<1x1x16x16xf32>
    %25 = vector.shape_cast %24 : vector<1x1x16x16xf32> to vector<16x16xf32>
    %26 = vector.shape_cast %23 : vector<16x16xf32> to vector<1x1x16x16xf32>
    tpu.vector_store %arg6[%c0_18, %c1, %c0_19, %c0_20], %26 {strides = array<i32>} : memref<1x20x16x16xf32, #tpu.memory_space<vmem>>, vector<1x1x16x16xf32>,
    %27 = vector.extract_strided_slice %1 {offsets = [2, 0, 0], sizes = [1, 8, 8], strides = [1, 1, 1]} : vector<20x8x8xf32> to vector<1x8x8xf32>
    %28 = vector.shape_cast %27 : vector<1x8x8xf32> to vector<8x8xf32>
    %cst_21 = arith.constant dense<0.000000e+00> : vector<8x16xf32>
    %29 = tpu.matmul %28, %3, %cst_21 {dimension_numbers = #tpu.dot_dimension_numbers<[1], [0], [0], [1], [0, 0, 1, 1], [], []>} : vector<8x8xf32>, vector<8x16xf32>, vector<8x16xf32> -> vector<8x16xf32>
    %30 = vector.extract_strided_slice %1 {offsets = [2, 0, 0], sizes = [1, 8, 8], strides = [1, 1, 1]} : vector<20x8x8xf32> to vector<1x8x8xf32>
    %31 = vector.shape_cast %30 : vector<1x8x8xf32> to vector<8x8xf32>
    %cst_22 = arith.constant dense<0.000000e+00> : vector<8x16xf32>
    %32 = tpu.matmul %31, %4, %cst_22 {dimension_numbers = #tpu.dot_dimension_numbers<[1], [0], [0], [1], [0, 0, 1, 1], [], []>} : vector<8x8xf32>, vector<8x16xf32>, vector<8x16xf32> -> vector<8x16xf32>
    %33 = arith.addf %29, %32 : vector<8x16xf32>
    %cst_23 = arith.constant dense<0.000000e+00> : vector<16x16xf32>
    %34 = tpu.matmul %2, %33, %cst_23 {dimension_numbers = #tpu.dot_dimension_numbers<[1], [0], [0], [1], [0, 0, 1, 1], [], []>} : vector<16x8xf32>, vector<8x16xf32>, vector<16x16xf32> -> vector<16x16xf32>
    %c0_24 = arith.constant 0 : index
    %c2 = arith.constant 2 : index
    %c0_25 = arith.constant 0 : index
    %c0_26 = arith.constant 0 : index
    %35 = vector.load %arg6[%c0_24, %c2, %c0_25, %c0_26] : memref<1x20x16x16xf32, #tpu.memory_space<vmem>>, vector<1x1x16x16xf32>
    %36 = vector.shape_cast %35 : vector<1x1x16x16xf32> to vector<16x16xf32>
    %37 = vector.shape_cast %34 : vector<16x16xf32> to vector<1x1x16x16xf32>
    tpu.vector_store %arg6[%c0_24, %c2, %c0_25, %c0_26], %37 {strides = array<i32>} : memref<1x20x16x16xf32, #tpu.memory_space<vmem>>, vector<1x1x16x16xf32>,
    %38 = vector.extract_strided_slice %1 {offsets = [3, 0, 0], sizes = [1, 8, 8], strides = [1, 1, 1]} : vector<20x8x8xf32> to vector<1x8x8xf32>
    %39 = vector.shape_cast %38 : vector<1x8x8xf32> to vector<8x8xf32>
    %cst_27 = arith.constant dense<0.000000e+00> : vector<8x16xf32>
    %40 = tpu.matmul %39, %3, %cst_27 {dimension_numbers = #tpu.dot_dimension_numbers<[1], [0], [0], [1], [0, 0, 1, 1], [], []>} : vector<8x8xf32>, vector<8x16xf32>, vector<8x16xf32> -> vector<8x16xf32>
    %41 = vector.extract_strided_slice %1 {offsets = [3, 0, 0], sizes = [1, 8, 8], strides = [1, 1, 1]} : vector<20x8x8xf32> to vector<1x8x8xf32>
    %42 = vector.shape_cast %41 : vector<1x8x8xf32> to vector<8x8xf32>
    %cst_28 = arith.constant dense<0.000000e+00> : vector<8x16xf32>
    %43 = tpu.matmul %42, %4, %cst_28 {dimension_numbers = #tpu.dot_dimension_numbers<[1], [0], [0], [1], [0, 0, 1, 1], [], []>} : vector<8x8xf32>, vector<8x16xf32>, vector<8x16xf32> -> vector<8x16xf32>
    %44 = arith.addf %40, %43 : vector<8x16xf32>
    %cst_29 = arith.constant dense<0.000000e+00> : vector<16x16xf32>
    %45 = tpu.matmul %2, %44, %cst_29 {dimension_numbers = #tpu.dot_dimension_numbers<[1], [0], [0], [1], [0, 0, 1, 1], [], []>} : vector<16x8xf32>, vector<8x16xf32>, vector<16x16xf32> -> vector<16x16xf32>
    %c0_30 = arith.constant 0 : index
    %c3 = arith.constant 3 : index
    %c0_31 = arith.constant 0 : index
    %c0_32 = arith.constant 0 : index
    %46 = vector.load %arg6[%c0_30, %c3, %c0_31, %c0_32] : memref<1x20x16x16xf32, #tpu.memory_space<vmem>>, vector<1x1x16x16xf32>
    %47 = vector.shape_cast %46 : vector<1x1x16x16xf32> to vector<16x16xf32>
    %48 = vector.shape_cast %45 : vector<16x16xf32> to vector<1x1x16x16xf32>
    tpu.vector_store %arg6[%c0_30, %c3, %c0_31, %c0_32], %48 {strides = array<i32>} : memref<1x20x16x16xf32, #tpu.memory_space<vmem>>, vector<1x1x16x16xf32>,
    %49 = vector.extract_strided_slice %1 {offsets = [4, 0, 0], sizes = [1, 8, 8], strides = [1, 1, 1]} : vector<20x8x8xf32> to vector<1x8x8xf32>
    %50 = vector.shape_cast %49 : vector<1x8x8xf32> to vector<8x8xf32>
    %cst_33 = arith.constant dense<0.000000e+00> : vector<8x16xf32>
    %51 = tpu.matmul %50, %3, %cst_33 {dimension_numbers = #tpu.dot_dimension_numbers<[1], [0], [0], [1], [0, 0, 1, 1], [], []>} : vector<8x8xf32>, vector<8x16xf32>, vector<8x16xf32> -> vector<8x16xf32>
    %52 = vector.extract_strided_slice %1 {offsets = [4, 0, 0], sizes = [1, 8, 8], strides = [1, 1, 1]} : vector<20x8x8xf32> to vector<1x8x8xf32>
    %53 = vector.shape_cast %52 : vector<1x8x8xf32> to vector<8x8xf32>
    %cst_34 = arith.constant dense<0.000000e+00> : vector<8x16xf32>
    %54 = tpu.matmul %53, %4, %cst_34 {dimension_numbers = #tpu.dot_dimension_numbers<[1], [0], [0], [1], [0, 0, 1, 1], [], []>} : vector<8x8xf32>, vector<8x16xf32>, vector<8x16xf32> -> vector<8x16xf32>
    %55 = arith.addf %51, %54 : vector<8x16xf32>
    %cst_35 = arith.constant dense<0.000000e+00> : vector<16x16xf32>
    %56 = tpu.matmul %2, %55, %cst_35 {dimension_numbers = #tpu.dot_dimension_numbers<[1], [0], [0], [1], [0, 0, 1, 1], [], []>} : vector<16x8xf32>, vector<8x16xf32>, vector<16x16xf32> -> vector<16x16xf32>
    %c0_36 = arith.constant 0 : index
    %c4 = arith.constant 4 : index
    %c0_37 = arith.constant 0 : index
    %c0_38 = arith.constant 0 : index
    %57 = vector.load %arg6[%c0_36, %c4, %c0_37, %c0_38] : memref<1x20x16x16xf32, #tpu.memory_space<vmem>>, vector<1x1x16x16xf32>
    %58 = vector.shape_cast %57 : vector<1x1x16x16xf32> to vector<16x16xf32>
    %59 = vector.shape_cast %56 : vector<16x16xf32> to vector<1x1x16x16xf32>
    tpu.vector_store %arg6[%c0_36, %c4, %c0_37, %c0_38], %59 {strides = array<i32>} : memref<1x20x16x16xf32, #tpu.memory_space<vmem>>, vector<1x1x16x16xf32>,
    %60 = vector.extract_strided_slice %1 {offsets = [5, 0, 0], sizes = [1, 8, 8], strides = [1, 1, 1]} : vector<20x8x8xf32> to vector<1x8x8xf32>
    %61 = vector.shape_cast %60 : vector<1x8x8xf32> to vector<8x8xf32>
    %cst_39 = arith.constant dense<0.000000e+00> : vector<8x16xf32>
    %62 = tpu.matmul %61, %3, %cst_39 {dimension_numbers = #tpu.dot_dimension_numbers<[1], [0], [0], [1], [0, 0, 1, 1], [], []>} : vector<8x8xf32>, vector<8x16xf32>, vector<8x16xf32> -> vector<8x16xf32>
    %63 = vector.extract_strided_slice %1 {offsets = [5, 0, 0], sizes = [1, 8, 8], strides = [1, 1, 1]} : vector<20x8x8xf32> to vector<1x8x8xf32>
    %64 = vector.shape_cast %63 : vector<1x8x8xf32> to vector<8x8xf32>
    %cst_40 = arith.constant dense<0.000000e+00> : vector<8x16xf32>
    %65 = tpu.matmul %64, %4, %cst_40 {dimension_numbers = #tpu.dot_dimension_numbers<[1], [0], [0], [1], [0, 0, 1, 1], [], []>} : vector<8x8xf32>, vector<8x16xf32>, vector<8x16xf32> -> vector<8x16xf32>
    %66 = arith.addf %62, %65 : vector<8x16xf32>
    %cst_41 = arith.constant dense<0.000000e+00> : vector<16x16xf32>
    %67 = tpu.matmul %2, %66, %cst_41 {dimension_numbers = #tpu.dot_dimension_numbers<[1], [0], [0], [1], [0, 0, 1, 1], [], []>} : vector<16x8xf32>, vector<8x16xf32>, vector<16x16xf32> -> vector<16x16xf32>
    %c0_42 = arith.constant 0 : index
    %c5 = arith.constant 5 : index
    %c0_43 = arith.constant 0 : index
    %c0_44 = arith.constant 0 : index
    %68 = vector.load %arg6[%c0_42, %c5, %c0_43, %c0_44] : memref<1x20x16x16xf32, #tpu.memory_space<vmem>>, vector<1x1x16x16xf32>
    %69 = vector.shape_cast %68 : vector<1x1x16x16xf32> to vector<16x16xf32>
    %70 = vector.shape_cast %67 : vector<16x16xf32> to vector<1x1x16x16xf32>
    tpu.vector_store %arg6[%c0_42, %c5, %c0_43, %c0_44], %70 {strides = array<i32>} : memref<1x20x16x16xf32, #tpu.memory_space<vmem>>, vector<1x1x16x16xf32>,
    %71 = vector.extract_strided_slice %1 {offsets = [6, 0, 0], sizes = [1, 8, 8], strides = [1, 1, 1]} : vector<20x8x8xf32> to vector<1x8x8xf32>
    %72 = vector.shape_cast %71 : vector<1x8x8xf32> to vector<8x8xf32>
    %cst_45 = arith.constant dense<0.000000e+00> : vector<8x16xf32>
    %73 = tpu.matmul %72, %3, %cst_45 {dimension_numbers = #tpu.dot_dimension_numbers<[1], [0], [0], [1], [0, 0, 1, 1], [], []>} : vector<8x8xf32>, vector<8x16xf32>, vector<8x16xf32> -> vector<8x16xf32>
    %74 = vector.extract_strided_slice %1 {offsets = [6, 0, 0], sizes = [1, 8, 8], strides = [1, 1, 1]} : vector<20x8x8xf32> to vector<1x8x8xf32>
    %75 = vector.shape_cast %74 : vector<1x8x8xf32> to vector<8x8xf32>
    %cst_46 = arith.constant dense<0.000000e+00> : vector<8x16xf32>
    %76 = tpu.matmul %75, %4, %cst_46 {dimension_numbers = #tpu.dot_dimension_numbers<[1], [0], [0], [1], [0, 0, 1, 1], [], []>} : vector<8x8xf32>, vector<8x16xf32>, vector<8x16xf32> -> vector<8x16xf32>
    %77 = arith.addf %73, %76 : vector<8x16xf32>
    %cst_47 = arith.constant dense<0.000000e+00> : vector<16x16xf32>
    %78 = tpu.matmul %2, %77, %cst_47 {dimension_numbers = #tpu.dot_dimension_numbers<[1], [0], [0], [1], [0, 0, 1, 1], [], []>} : vector<16x8xf32>, vector<8x16xf32>, vector<16x16xf32> -> vector<16x16xf32>
    %c0_48 = arith.constant 0 : index
    %c6 = arith.constant 6 : index
    %c0_49 = arith.constant 0 : index
    %c0_50 = arith.constant 0 : index
    %79 = vector.load %arg6[%c0_48, %c6, %c0_49, %c0_50] : memref<1x20x16x16xf32, #tpu.memory_space<vmem>>, vector<1x1x16x16xf32>
    %80 = vector.shape_cast %79 : vector<1x1x16x16xf32> to vector<16x16xf32>
    %81 = vector.shape_cast %78 : vector<16x16xf32> to vector<1x1x16x16xf32>
    tpu.vector_store %arg6[%c0_48, %c6, %c0_49, %c0_50], %81 {strides = array<i32>} : memref<1x20x16x16xf32, #tpu.memory_space<vmem>>, vector<1x1x16x16xf32>,
    %82 = vector.extract_strided_slice %1 {offsets = [7, 0, 0], sizes = [1, 8, 8], strides = [1, 1, 1]} : vector<20x8x8xf32> to vector<1x8x8xf32>
    %83 = vector.shape_cast %82 : vector<1x8x8xf32> to vector<8x8xf32>
    %cst_51 = arith.constant dense<0.000000e+00> : vector<8x16xf32>
    %84 = tpu.matmul %83, %3, %cst_51 {dimension_numbers = #tpu.dot_dimension_numbers<[1], [0], [0], [1], [0, 0, 1, 1], [], []>} : vector<8x8xf32>, vector<8x16xf32>, vector<8x16xf32> -> vector<8x16xf32>
    %85 = vector.extract_strided_slice %1 {offsets = [7, 0, 0], sizes = [1, 8, 8], strides = [1, 1, 1]} : vector<20x8x8xf32> to vector<1x8x8xf32>
    %86 = vector.shape_cast %85 : vector<1x8x8xf32> to vector<8x8xf32>
    %cst_52 = arith.constant dense<0.000000e+00> : vector<8x16xf32>
    %87 = tpu.matmul %86, %4, %cst_52 {dimension_numbers = #tpu.dot_dimension_numbers<[1], [0], [0], [1], [0, 0, 1, 1], [], []>} : vector<8x8xf32>, vector<8x16xf32>, vector<8x16xf32> -> vector<8x16xf32>
    %88 = arith.addf %84, %87 : vector<8x16xf32>
    %cst_53 = arith.constant dense<0.000000e+00> : vector<16x16xf32>
    %89 = tpu.matmul %2, %88, %cst_53 {dimension_numbers = #tpu.dot_dimension_numbers<[1], [0], [0], [1], [0, 0, 1, 1], [], []>} : vector<16x8xf32>, vector<8x16xf32>, vector<16x16xf32> -> vector<16x16xf32>
    %c0_54 = arith.constant 0 : index
    %c7 = arith.constant 7 : index
    %c0_55 = arith.constant 0 : index
    %c0_56 = arith.constant 0 : index
    %90 = vector.load %arg6[%c0_54, %c7, %c0_55, %c0_56] : memref<1x20x16x16xf32, #tpu.memory_space<vmem>>, vector<1x1x16x16xf32>
    %91 = vector.shape_cast %90 : vector<1x1x16x16xf32> to vector<16x16xf32>
    %92 = vector.shape_cast %89 : vector<16x16xf32> to vector<1x1x16x16xf32>
    tpu.vector_store %arg6[%c0_54, %c7, %c0_55, %c0_56], %92 {strides = array<i32>} : memref<1x20x16x16xf32, #tpu.memory_space<vmem>>, vector<1x1x16x16xf32>,
    %93 = vector.extract_strided_slice %1 {offsets = [8, 0, 0], sizes = [1, 8, 8], strides = [1, 1, 1]} : vector<20x8x8xf32> to vector<1x8x8xf32>
    %94 = vector.shape_cast %93 : vector<1x8x8xf32> to vector<8x8xf32>
    %cst_57 = arith.constant dense<0.000000e+00> : vector<8x16xf32>
    %95 = tpu.matmul %94, %3, %cst_57 {dimension_numbers = #tpu.dot_dimension_numbers<[1], [0], [0], [1], [0, 0, 1, 1], [], []>} : vector<8x8xf32>, vector<8x16xf32>, vector<8x16xf32> -> vector<8x16xf32>
    %96 = vector.extract_strided_slice %1 {offsets = [8, 0, 0], sizes = [1, 8, 8], strides = [1, 1, 1]} : vector<20x8x8xf32> to vector<1x8x8xf32>
    %97 = vector.shape_cast %96 : vector<1x8x8xf32> to vector<8x8xf32>
    %cst_58 = arith.constant dense<0.000000e+00> : vector<8x16xf32>
    %98 = tpu.matmul %97, %4, %cst_58 {dimension_numbers = #tpu.dot_dimension_numbers<[1], [0], [0], [1], [0, 0, 1, 1], [], []>} : vector<8x8xf32>, vector<8x16xf32>, vector<8x16xf32> -> vector<8x16xf32>
    %99 = arith.addf %95, %98 : vector<8x16xf32>
    %cst_59 = arith.constant dense<0.000000e+00> : vector<16x16xf32>
    %100 = tpu.matmul %2, %99, %cst_59 {dimension_numbers = #tpu.dot_dimension_numbers<[1], [0], [0], [1], [0, 0, 1, 1], [], []>} : vector<16x8xf32>, vector<8x16xf32>, vector<16x16xf32> -> vector<16x16xf32>
    %c0_60 = arith.constant 0 : index
    %c8 = arith.constant 8 : index
    %c0_61 = arith.constant 0 : index
    %c0_62 = arith.constant 0 : index
    %101 = vector.load %arg6[%c0_60, %c8, %c0_61, %c0_62] : memref<1x20x16x16xf32, #tpu.memory_space<vmem>>, vector<1x1x16x16xf32>
    %102 = vector.shape_cast %101 : vector<1x1x16x16xf32> to vector<16x16xf32>
    %103 = vector.shape_cast %100 : vector<16x16xf32> to vector<1x1x16x16xf32>
    tpu.vector_store %arg6[%c0_60, %c8, %c0_61, %c0_62], %103 {strides = array<i32>} : memref<1x20x16x16xf32, #tpu.memory_space<vmem>>, vector<1x1x16x16xf32>,
    %104 = vector.extract_strided_slice %1 {offsets = [9, 0, 0], sizes = [1, 8, 8], strides = [1, 1, 1]} : vector<20x8x8xf32> to vector<1x8x8xf32>
    %105 = vector.shape_cast %104 : vector<1x8x8xf32> to vector<8x8xf32>
    %cst_63 = arith.constant dense<0.000000e+00> : vector<8x16xf32>
    %106 = tpu.matmul %105, %3, %cst_63 {dimension_numbers = #tpu.dot_dimension_numbers<[1], [0], [0], [1], [0, 0, 1, 1], [], []>} : vector<8x8xf32>, vector<8x16xf32>, vector<8x16xf32> -> vector<8x16xf32>
    %107 = vector.extract_strided_slice %1 {offsets = [9, 0, 0], sizes = [1, 8, 8], strides = [1, 1, 1]} : vector<20x8x8xf32> to vector<1x8x8xf32>
    %108 = vector.shape_cast %107 : vector<1x8x8xf32> to vector<8x8xf32>
    %cst_64 = arith.constant dense<0.000000e+00> : vector<8x16xf32>
    %109 = tpu.matmul %108, %4, %cst_64 {dimension_numbers = #tpu.dot_dimension_numbers<[1], [0], [0], [1], [0, 0, 1, 1], [], []>} : vector<8x8xf32>, vector<8x16xf32>, vector<8x16xf32> -> vector<8x16xf32>
    %110 = arith.addf %106, %109 : vector<8x16xf32>
    %cst_65 = arith.constant dense<0.000000e+00> : vector<16x16xf32>
    %111 = tpu.matmul %2, %110, %cst_65 {dimension_numbers = #tpu.dot_dimension_numbers<[1], [0], [0], [1], [0, 0, 1, 1], [], []>} : vector<16x8xf32>, vector<8x16xf32>, vector<16x16xf32> -> vector<16x16xf32>
    %c0_66 = arith.constant 0 : index
    %c9 = arith.constant 9 : index
    %c0_67 = arith.constant 0 : index
    %c0_68 = arith.constant 0 : index
    %112 = vector.load %arg6[%c0_66, %c9, %c0_67, %c0_68] : memref<1x20x16x16xf32, #tpu.memory_space<vmem>>, vector<1x1x16x16xf32>
    %113 = vector.shape_cast %112 : vector<1x1x16x16xf32> to vector<16x16xf32>
    %114 = vector.shape_cast %111 : vector<16x16xf32> to vector<1x1x16x16xf32>
    tpu.vector_store %arg6[%c0_66, %c9, %c0_67, %c0_68], %114 {strides = array<i32>} : memref<1x20x16x16xf32, #tpu.memory_space<vmem>>, vector<1x1x16x16xf32>,
    %115 = vector.extract_strided_slice %1 {offsets = [10, 0, 0], sizes = [1, 8, 8], strides = [1, 1, 1]} : vector<20x8x8xf32> to vector<1x8x8xf32>
    %116 = vector.shape_cast %115 : vector<1x8x8xf32> to vector<8x8xf32>
    %cst_69 = arith.constant dense<0.000000e+00> : vector<8x16xf32>
    %117 = tpu.matmul %116, %3, %cst_69 {dimension_numbers = #tpu.dot_dimension_numbers<[1], [0], [0], [1], [0, 0, 1, 1], [], []>} : vector<8x8xf32>, vector<8x16xf32>, vector<8x16xf32> -> vector<8x16xf32>
    %118 = vector.extract_strided_slice %1 {offsets = [10, 0, 0], sizes = [1, 8, 8], strides = [1, 1, 1]} : vector<20x8x8xf32> to vector<1x8x8xf32>
    %119 = vector.shape_cast %118 : vector<1x8x8xf32> to vector<8x8xf32>
    %cst_70 = arith.constant dense<0.000000e+00> : vector<8x16xf32>
    %120 = tpu.matmul %119, %4, %cst_70 {dimension_numbers = #tpu.dot_dimension_numbers<[1], [0], [0], [1], [0, 0, 1, 1], [], []>} : vector<8x8xf32>, vector<8x16xf32>, vector<8x16xf32> -> vector<8x16xf32>
    %121 = arith.addf %117, %120 : vector<8x16xf32>
    %cst_71 = arith.constant dense<0.000000e+00> : vector<16x16xf32>
    %122 = tpu.matmul %2, %121, %cst_71 {dimension_numbers = #tpu.dot_dimension_numbers<[1], [0], [0], [1], [0, 0, 1, 1], [], []>} : vector<16x8xf32>, vector<8x16xf32>, vector<16x16xf32> -> vector<16x16xf32>
    %c0_72 = arith.constant 0 : index
    %c10 = arith.constant 10 : index
    %c0_73 = arith.constant 0 : index
    %c0_74 = arith.constant 0 : index
    %123 = vector.load %arg6[%c0_72, %c10, %c0_73, %c0_74] : memref<1x20x16x16xf32, #tpu.memory_space<vmem>>, vector<1x1x16x16xf32>
    %124 = vector.shape_cast %123 : vector<1x1x16x16xf32> to vector<16x16xf32>
    %125 = vector.shape_cast %122 : vector<16x16xf32> to vector<1x1x16x16xf32>
    tpu.vector_store %arg6[%c0_72, %c10, %c0_73, %c0_74], %125 {strides = array<i32>} : memref<1x20x16x16xf32, #tpu.memory_space<vmem>>, vector<1x1x16x16xf32>,
    %126 = vector.extract_strided_slice %1 {offsets = [11, 0, 0], sizes = [1, 8, 8], strides = [1, 1, 1]} : vector<20x8x8xf32> to vector<1x8x8xf32>
    %127 = vector.shape_cast %126 : vector<1x8x8xf32> to vector<8x8xf32>
    %cst_75 = arith.constant dense<0.000000e+00> : vector<8x16xf32>
    %128 = tpu.matmul %127, %3, %cst_75 {dimension_numbers = #tpu.dot_dimension_numbers<[1], [0], [0], [1], [0, 0, 1, 1], [], []>} : vector<8x8xf32>, vector<8x16xf32>, vector<8x16xf32> -> vector<8x16xf32>
    %129 = vector.extract_strided_slice %1 {offsets = [11, 0, 0], sizes = [1, 8, 8], strides = [1, 1, 1]} : vector<20x8x8xf32> to vector<1x8x8xf32>
    %130 = vector.shape_cast %129 : vector<1x8x8xf32> to vector<8x8xf32>
    %cst_76 = arith.constant dense<0.000000e+00> : vector<8x16xf32>
    %131 = tpu.matmul %130, %4, %cst_76 {dimension_numbers = #tpu.dot_dimension_numbers<[1], [0], [0], [1], [0, 0, 1, 1], [], []>} : vector<8x8xf32>, vector<8x16xf32>, vector<8x16xf32> -> vector<8x16xf32>
    %132 = arith.addf %128, %131 : vector<8x16xf32>
    %cst_77 = arith.constant dense<0.000000e+00> : vector<16x16xf32>
    %133 = tpu.matmul %2, %132, %cst_77 {dimension_numbers = #tpu.dot_dimension_numbers<[1], [0], [0], [1], [0, 0, 1, 1], [], []>} : vector<16x8xf32>, vector<8x16xf32>, vector<16x16xf32> -> vector<16x16xf32>
    %c0_78 = arith.constant 0 : index
    %c11 = arith.constant 11 : index
    %c0_79 = arith.constant 0 : index
    %c0_80 = arith.constant 0 : index
    %134 = vector.load %arg6[%c0_78, %c11, %c0_79, %c0_80] : memref<1x20x16x16xf32, #tpu.memory_space<vmem>>, vector<1x1x16x16xf32>
    %135 = vector.shape_cast %134 : vector<1x1x16x16xf32> to vector<16x16xf32>
    %136 = vector.shape_cast %133 : vector<16x16xf32> to vector<1x1x16x16xf32>
    tpu.vector_store %arg6[%c0_78, %c11, %c0_79, %c0_80], %136 {strides = array<i32>} : memref<1x20x16x16xf32, #tpu.memory_space<vmem>>, vector<1x1x16x16xf32>,
    %137 = vector.extract_strided_slice %1 {offsets = [12, 0, 0], sizes = [1, 8, 8], strides = [1, 1, 1]} : vector<20x8x8xf32> to vector<1x8x8xf32>
    %138 = vector.shape_cast %137 : vector<1x8x8xf32> to vector<8x8xf32>
    %cst_81 = arith.constant dense<0.000000e+00> : vector<8x16xf32>
    %139 = tpu.matmul %138, %3, %cst_81 {dimension_numbers = #tpu.dot_dimension_numbers<[1], [0], [0], [1], [0, 0, 1, 1], [], []>} : vector<8x8xf32>, vector<8x16xf32>, vector<8x16xf32> -> vector<8x16xf32>
    %140 = vector.extract_strided_slice %1 {offsets = [12, 0, 0], sizes = [1, 8, 8], strides = [1, 1, 1]} : vector<20x8x8xf32> to vector<1x8x8xf32>
    %141 = vector.shape_cast %140 : vector<1x8x8xf32> to vector<8x8xf32>
    %cst_82 = arith.constant dense<0.000000e+00> : vector<8x16xf32>
    %142 = tpu.matmul %141, %4, %cst_82 {dimension_numbers = #tpu.dot_dimension_numbers<[1], [0], [0], [1], [0, 0, 1, 1], [], []>} : vector<8x8xf32>, vector<8x16xf32>, vector<8x16xf32> -> vector<8x16xf32>
    %143 = arith.addf %139, %142 : vector<8x16xf32>
    %cst_83 = arith.constant dense<0.000000e+00> : vector<16x16xf32>
    %144 = tpu.matmul %2, %143, %cst_83 {dimension_numbers = #tpu.dot_dimension_numbers<[1], [0], [0], [1], [0, 0, 1, 1], [], []>} : vector<16x8xf32>, vector<8x16xf32>, vector<16x16xf32> -> vector<16x16xf32>
    %c0_84 = arith.constant 0 : index
    %c12 = arith.constant 12 : index
    %c0_85 = arith.constant 0 : index
    %c0_86 = arith.constant 0 : index
    %145 = vector.load %arg6[%c0_84, %c12, %c0_85, %c0_86] : memref<1x20x16x16xf32, #tpu.memory_space<vmem>>, vector<1x1x16x16xf32>
    %146 = vector.shape_cast %145 : vector<1x1x16x16xf32> to vector<16x16xf32>
    %147 = vector.shape_cast %144 : vector<16x16xf32> to vector<1x1x16x16xf32>
    tpu.vector_store %arg6[%c0_84, %c12, %c0_85, %c0_86], %147 {strides = array<i32>} : memref<1x20x16x16xf32, #tpu.memory_space<vmem>>, vector<1x1x16x16xf32>,
    %148 = vector.extract_strided_slice %1 {offsets = [13, 0, 0], sizes = [1, 8, 8], strides = [1, 1, 1]} : vector<20x8x8xf32> to vector<1x8x8xf32>
    %149 = vector.shape_cast %148 : vector<1x8x8xf32> to vector<8x8xf32>
    %cst_87 = arith.constant dense<0.000000e+00> : vector<8x16xf32>
    %150 = tpu.matmul %149, %3, %cst_87 {dimension_numbers = #tpu.dot_dimension_numbers<[1], [0], [0], [1], [0, 0, 1, 1], [], []>} : vector<8x8xf32>, vector<8x16xf32>, vector<8x16xf32> -> vector<8x16xf32>
    %151 = vector.extract_strided_slice %1 {offsets = [13, 0, 0], sizes = [1, 8, 8], strides = [1, 1, 1]} : vector<20x8x8xf32> to vector<1x8x8xf32>
    %152 = vector.shape_cast %151 : vector<1x8x8xf32> to vector<8x8xf32>
    %cst_88 = arith.constant dense<0.000000e+00> : vector<8x16xf32>
    %153 = tpu.matmul %152, %4, %cst_88 {dimension_numbers = #tpu.dot_dimension_numbers<[1], [0], [0], [1], [0, 0, 1, 1], [], []>} : vector<8x8xf32>, vector<8x16xf32>, vector<8x16xf32> -> vector<8x16xf32>
    %154 = arith.addf %150, %153 : vector<8x16xf32>
    %cst_89 = arith.constant dense<0.000000e+00> : vector<16x16xf32>
    %155 = tpu.matmul %2, %154, %cst_89 {dimension_numbers = #tpu.dot_dimension_numbers<[1], [0], [0], [1], [0, 0, 1, 1], [], []>} : vector<16x8xf32>, vector<8x16xf32>, vector<16x16xf32> -> vector<16x16xf32>
    %c0_90 = arith.constant 0 : index
    %c13 = arith.constant 13 : index
    %c0_91 = arith.constant 0 : index
    %c0_92 = arith.constant 0 : index
    %156 = vector.load %arg6[%c0_90, %c13, %c0_91, %c0_92] : memref<1x20x16x16xf32, #tpu.memory_space<vmem>>, vector<1x1x16x16xf32>
    %157 = vector.shape_cast %156 : vector<1x1x16x16xf32> to vector<16x16xf32>
    %158 = vector.shape_cast %155 : vector<16x16xf32> to vector<1x1x16x16xf32>
    tpu.vector_store %arg6[%c0_90, %c13, %c0_91, %c0_92], %158 {strides = array<i32>} : memref<1x20x16x16xf32, #tpu.memory_space<vmem>>, vector<1x1x16x16xf32>,
    %159 = vector.extract_strided_slice %1 {offsets = [14, 0, 0], sizes = [1, 8, 8], strides = [1, 1, 1]} : vector<20x8x8xf32> to vector<1x8x8xf32>
    %160 = vector.shape_cast %159 : vector<1x8x8xf32> to vector<8x8xf32>
    %cst_93 = arith.constant dense<0.000000e+00> : vector<8x16xf32>
    %161 = tpu.matmul %160, %3, %cst_93 {dimension_numbers = #tpu.dot_dimension_numbers<[1], [0], [0], [1], [0, 0, 1, 1], [], []>} : vector<8x8xf32>, vector<8x16xf32>, vector<8x16xf32> -> vector<8x16xf32>
    %162 = vector.extract_strided_slice %1 {offsets = [15, 0, 0], sizes = [1, 8, 8], strides = [1, 1, 1]} : vector<20x8x8xf32> to vector<1x8x8xf32>
    %163 = vector.shape_cast %162 : vector<1x8x8xf32> to vector<8x8xf32>
    %cst_94 = arith.constant dense<0.000000e+00> : vector<8x16xf32>
    %164 = tpu.matmul %163, %4, %cst_94 {dimension_numbers = #tpu.dot_dimension_numbers<[1], [0], [0], [1], [0, 0, 1, 1], [], []>} : vector<8x8xf32>, vector<8x16xf32>, vector<8x16xf32> -> vector<8x16xf32>
    %165 = arith.addf %161, %164 : vector<8x16xf32>
    %cst_95 = arith.constant dense<0.000000e+00> : vector<16x16xf32>
    %166 = tpu.matmul %2, %165, %cst_95 {dimension_numbers = #tpu.dot_dimension_numbers<[1], [0], [0], [1], [0, 0, 1, 1], [], []>} : vector<16x8xf32>, vector<8x16xf32>, vector<16x16xf32> -> vector<16x16xf32>
    %c0_96 = arith.constant 0 : index
    %c14 = arith.constant 14 : index
    %c0_97 = arith.constant 0 : index
    %c0_98 = arith.constant 0 : index
    %167 = vector.load %arg6[%c0_96, %c14, %c0_97, %c0_98] : memref<1x20x16x16xf32, #tpu.memory_space<vmem>>, vector<1x1x16x16xf32>
    %168 = vector.shape_cast %167 : vector<1x1x16x16xf32> to vector<16x16xf32>
    %169 = vector.shape_cast %166 : vector<16x16xf32> to vector<1x1x16x16xf32>
    tpu.vector_store %arg6[%c0_96, %c14, %c0_97, %c0_98], %169 {strides = array<i32>} : memref<1x20x16x16xf32, #tpu.memory_space<vmem>>, vector<1x1x16x16xf32>,
    %170 = vector.extract_strided_slice %1 {offsets = [15, 0, 0], sizes = [1, 8, 8], strides = [1, 1, 1]} : vector<20x8x8xf32> to vector<1x8x8xf32>
    %171 = vector.shape_cast %170 : vector<1x8x8xf32> to vector<8x8xf32>
    %cst_99 = arith.constant dense<0.000000e+00> : vector<8x16xf32>
    %172 = tpu.matmul %171, %3, %cst_99 {dimension_numbers = #tpu.dot_dimension_numbers<[1], [0], [0], [1], [0, 0, 1, 1], [], []>} : vector<8x8xf32>, vector<8x16xf32>, vector<8x16xf32> -> vector<8x16xf32>
    %173 = vector.extract_strided_slice %1 {offsets = [14, 0, 0], sizes = [1, 8, 8], strides = [1, 1, 1]} : vector<20x8x8xf32> to vector<1x8x8xf32>
    %174 = vector.shape_cast %173 : vector<1x8x8xf32> to vector<8x8xf32>
    %cst_100 = arith.constant dense<0.000000e+00> : vector<8x16xf32>
    %175 = tpu.matmul %174, %4, %cst_100 {dimension_numbers = #tpu.dot_dimension_numbers<[1], [0], [0], [1], [0, 0, 1, 1], [], []>} : vector<8x8xf32>, vector<8x16xf32>, vector<8x16xf32> -> vector<8x16xf32>
    %176 = arith.addf %172, %175 : vector<8x16xf32>
    %cst_101 = arith.constant dense<0.000000e+00> : vector<16x16xf32>
    %177 = tpu.matmul %2, %176, %cst_101 {dimension_numbers = #tpu.dot_dimension_numbers<[1], [0], [0], [1], [0, 0, 1, 1], [], []>} : vector<16x8xf32>, vector<8x16xf32>, vector<16x16xf32> -> vector<16x16xf32>
    %c0_102 = arith.constant 0 : index
    %c15 = arith.constant 15 : index
    %c0_103 = arith.constant 0 : index
    %c0_104 = arith.constant 0 : index
    %178 = vector.load %arg6[%c0_102, %c15, %c0_103, %c0_104] : memref<1x20x16x16xf32, #tpu.memory_space<vmem>>, vector<1x1x16x16xf32>
    %179 = vector.shape_cast %178 : vector<1x1x16x16xf32> to vector<16x16xf32>
    %180 = vector.shape_cast %177 : vector<16x16xf32> to vector<1x1x16x16xf32>
    tpu.vector_store %arg6[%c0_102, %c15, %c0_103, %c0_104], %180 {strides = array<i32>} : memref<1x20x16x16xf32, #tpu.memory_space<vmem>>, vector<1x1x16x16xf32>,
    %181 = vector.extract_strided_slice %1 {offsets = [16, 0, 0], sizes = [1, 8, 8], strides = [1, 1, 1]} : vector<20x8x8xf32> to vector<1x8x8xf32>
    %182 = vector.shape_cast %181 : vector<1x8x8xf32> to vector<8x8xf32>
    %cst_105 = arith.constant dense<0.000000e+00> : vector<8x16xf32>
    %183 = tpu.matmul %182, %3, %cst_105 {dimension_numbers = #tpu.dot_dimension_numbers<[1], [0], [0], [1], [0, 0, 1, 1], [], []>} : vector<8x8xf32>, vector<8x16xf32>, vector<8x16xf32> -> vector<8x16xf32>
    %184 = vector.extract_strided_slice %1 {offsets = [17, 0, 0], sizes = [1, 8, 8], strides = [1, 1, 1]} : vector<20x8x8xf32> to vector<1x8x8xf32>
    %185 = vector.shape_cast %184 : vector<1x8x8xf32> to vector<8x8xf32>
    %cst_106 = arith.constant dense<0.000000e+00> : vector<8x16xf32>
    %186 = tpu.matmul %185, %4, %cst_106 {dimension_numbers = #tpu.dot_dimension_numbers<[1], [0], [0], [1], [0, 0, 1, 1], [], []>} : vector<8x8xf32>, vector<8x16xf32>, vector<8x16xf32> -> vector<8x16xf32>
    %187 = arith.addf %183, %186 : vector<8x16xf32>
    %cst_107 = arith.constant dense<0.000000e+00> : vector<16x16xf32>
    %188 = tpu.matmul %2, %187, %cst_107 {dimension_numbers = #tpu.dot_dimension_numbers<[1], [0], [0], [1], [0, 0, 1, 1], [], []>} : vector<16x8xf32>, vector<8x16xf32>, vector<16x16xf32> -> vector<16x16xf32>
    %c0_108 = arith.constant 0 : index
    %c16 = arith.constant 16 : index
    %c0_109 = arith.constant 0 : index
    %c0_110 = arith.constant 0 : index
    %189 = vector.load %arg6[%c0_108, %c16, %c0_109, %c0_110] : memref<1x20x16x16xf32, #tpu.memory_space<vmem>>, vector<1x1x16x16xf32>
    %190 = vector.shape_cast %189 : vector<1x1x16x16xf32> to vector<16x16xf32>
    %191 = vector.shape_cast %188 : vector<16x16xf32> to vector<1x1x16x16xf32>
    tpu.vector_store %arg6[%c0_108, %c16, %c0_109, %c0_110], %191 {strides = array<i32>} : memref<1x20x16x16xf32, #tpu.memory_space<vmem>>, vector<1x1x16x16xf32>,
    %192 = vector.extract_strided_slice %1 {offsets = [17, 0, 0], sizes = [1, 8, 8], strides = [1, 1, 1]} : vector<20x8x8xf32> to vector<1x8x8xf32>
    %193 = vector.shape_cast %192 : vector<1x8x8xf32> to vector<8x8xf32>
    %cst_111 = arith.constant dense<0.000000e+00> : vector<8x16xf32>
    %194 = tpu.matmul %193, %3, %cst_111 {dimension_numbers = #tpu.dot_dimension_numbers<[1], [0], [0], [1], [0, 0, 1, 1], [], []>} : vector<8x8xf32>, vector<8x16xf32>, vector<8x16xf32> -> vector<8x16xf32>
    %195 = vector.extract_strided_slice %1 {offsets = [16, 0, 0], sizes = [1, 8, 8], strides = [1, 1, 1]} : vector<20x8x8xf32> to vector<1x8x8xf32>
    %196 = vector.shape_cast %195 : vector<1x8x8xf32> to vector<8x8xf32>
    %cst_112 = arith.constant dense<0.000000e+00> : vector<8x16xf32>
    %197 = tpu.matmul %196, %4, %cst_112 {dimension_numbers = #tpu.dot_dimension_numbers<[1], [0], [0], [1], [0, 0, 1, 1], [], []>} : vector<8x8xf32>, vector<8x16xf32>, vector<8x16xf32> -> vector<8x16xf32>
    %198 = arith.addf %194, %197 : vector<8x16xf32>
    %cst_113 = arith.constant dense<0.000000e+00> : vector<16x16xf32>
    %199 = tpu.matmul %2, %198, %cst_113 {dimension_numbers = #tpu.dot_dimension_numbers<[1], [0], [0], [1], [0, 0, 1, 1], [], []>} : vector<16x8xf32>, vector<8x16xf32>, vector<16x16xf32> -> vector<16x16xf32>
    %c0_114 = arith.constant 0 : index
    %c17 = arith.constant 17 : index
    %c0_115 = arith.constant 0 : index
    %c0_116 = arith.constant 0 : index
    %200 = vector.load %arg6[%c0_114, %c17, %c0_115, %c0_116] : memref<1x20x16x16xf32, #tpu.memory_space<vmem>>, vector<1x1x16x16xf32>
    %201 = vector.shape_cast %200 : vector<1x1x16x16xf32> to vector<16x16xf32>
    %202 = vector.shape_cast %199 : vector<16x16xf32> to vector<1x1x16x16xf32>
    tpu.vector_store %arg6[%c0_114, %c17, %c0_115, %c0_116], %202 {strides = array<i32>} : memref<1x20x16x16xf32, #tpu.memory_space<vmem>>, vector<1x1x16x16xf32>,
    %203 = vector.extract_strided_slice %1 {offsets = [18, 0, 0], sizes = [1, 8, 8], strides = [1, 1, 1]} : vector<20x8x8xf32> to vector<1x8x8xf32>
    %204 = vector.shape_cast %203 : vector<1x8x8xf32> to vector<8x8xf32>
    %cst_117 = arith.constant dense<0.000000e+00> : vector<8x16xf32>
    %205 = tpu.matmul %204, %3, %cst_117 {dimension_numbers = #tpu.dot_dimension_numbers<[1], [0], [0], [1], [0, 0, 1, 1], [], []>} : vector<8x8xf32>, vector<8x16xf32>, vector<8x16xf32> -> vector<8x16xf32>
    %206 = vector.extract_strided_slice %1 {offsets = [19, 0, 0], sizes = [1, 8, 8], strides = [1, 1, 1]} : vector<20x8x8xf32> to vector<1x8x8xf32>
    %207 = vector.shape_cast %206 : vector<1x8x8xf32> to vector<8x8xf32>
    %cst_118 = arith.constant dense<0.000000e+00> : vector<8x16xf32>
    %208 = tpu.matmul %207, %4, %cst_118 {dimension_numbers = #tpu.dot_dimension_numbers<[1], [0], [0], [1], [0, 0, 1, 1], [], []>} : vector<8x8xf32>, vector<8x16xf32>, vector<8x16xf32> -> vector<8x16xf32>
    %209 = arith.addf %205, %208 : vector<8x16xf32>
    %cst_119 = arith.constant dense<0.000000e+00> : vector<16x16xf32>
    %210 = tpu.matmul %2, %209, %cst_119 {dimension_numbers = #tpu.dot_dimension_numbers<[1], [0], [0], [1], [0, 0, 1, 1], [], []>} : vector<16x8xf32>, vector<8x16xf32>, vector<16x16xf32> -> vector<16x16xf32>
    %c0_120 = arith.constant 0 : index
    %c18 = arith.constant 18 : index
    %c0_121 = arith.constant 0 : index
    %c0_122 = arith.constant 0 : index
    %211 = vector.load %arg6[%c0_120, %c18, %c0_121, %c0_122] : memref<1x20x16x16xf32, #tpu.memory_space<vmem>>, vector<1x1x16x16xf32>
    %212 = vector.shape_cast %211 : vector<1x1x16x16xf32> to vector<16x16xf32>
    %213 = vector.shape_cast %210 : vector<16x16xf32> to vector<1x1x16x16xf32>
    tpu.vector_store %arg6[%c0_120, %c18, %c0_121, %c0_122], %213 {strides = array<i32>} : memref<1x20x16x16xf32, #tpu.memory_space<vmem>>, vector<1x1x16x16xf32>,
    %214 = vector.extract_strided_slice %1 {offsets = [19, 0, 0], sizes = [1, 8, 8], strides = [1, 1, 1]} : vector<20x8x8xf32> to vector<1x8x8xf32>
    %215 = vector.shape_cast %214 : vector<1x8x8xf32> to vector<8x8xf32>
    %cst_123 = arith.constant dense<0.000000e+00> : vector<8x16xf32>
    %216 = tpu.matmul %215, %3, %cst_123 {dimension_numbers = #tpu.dot_dimension_numbers<[1], [0], [0], [1], [0, 0, 1, 1], [], []>} : vector<8x8xf32>, vector<8x16xf32>, vector<8x16xf32> -> vector<8x16xf32>
    %217 = vector.extract_strided_slice %1 {offsets = [18, 0, 0], sizes = [1, 8, 8], strides = [1, 1, 1]} : vector<20x8x8xf32> to vector<1x8x8xf32>
    %218 = vector.shape_cast %217 : vector<1x8x8xf32> to vector<8x8xf32>
    %cst_124 = arith.constant dense<0.000000e+00> : vector<8x16xf32>
    %219 = tpu.matmul %218, %4, %cst_124 {dimension_numbers = #tpu.dot_dimension_numbers<[1], [0], [0], [1], [0, 0, 1, 1], [], []>} : vector<8x8xf32>, vector<8x16xf32>, vector<8x16xf32> -> vector<8x16xf32>
    %220 = arith.addf %216, %219 : vector<8x16xf32>
    %cst_125 = arith.constant dense<0.000000e+00> : vector<16x16xf32>
    %221 = tpu.matmul %2, %220, %cst_125 {dimension_numbers = #tpu.dot_dimension_numbers<[1], [0], [0], [1], [0, 0, 1, 1], [], []>} : vector<16x8xf32>, vector<8x16xf32>, vector<16x16xf32> -> vector<16x16xf32>
    %c0_126 = arith.constant 0 : index
    %c19 = arith.constant 19 : index
    %c0_127 = arith.constant 0 : index
    %c0_128 = arith.constant 0 : index
    %222 = vector.load %arg6[%c0_126, %c19, %c0_127, %c0_128] : memref<1x20x16x16xf32, #tpu.memory_space<vmem>>, vector<1x1x16x16xf32>
    %223 = vector.shape_cast %222 : vector<1x1x16x16xf32> to vector<16x16xf32>
    %224 = vector.shape_cast %221 : vector<16x16xf32> to vector<1x1x16x16xf32>
    tpu.vector_store %arg6[%c0_126, %c19, %c0_127, %c0_128], %224 {strides = array<i32>} : memref<1x20x16x16xf32, #tpu.memory_space<vmem>>, vector<1x1x16x16xf32>,
    return
  }
  func.func @transform_0(%arg0: i32, %arg1: i32) -> (i32, i32, i32, i32) {
    %c0_i32 = arith.constant 0 : i32
    %c0_i32_0 = arith.constant 0 : i32
    %c0_i32_1 = arith.constant 0 : i32
    %c0_i32_2 = arith.constant 0 : i32
    return %arg0, %c0_i32, %c0_i32_0, %c0_i32_1 : i32, i32, i32, i32
  }
  func.func @transform_1(%arg0: i32, %arg1: i32) -> (i32, i32) {
    %c0_i32 = arith.constant 0 : i32
    %c0_i32_0 = arith.constant 0 : i32
    return %arg1, %c0_i32 : i32, i32
  }
  func.func @transform_2(%arg0: i32, %arg1: i32) -> (i32, i32) {
    %c0_i32 = arith.constant 0 : i32
    %c0_i32_0 = arith.constant 0 : i32
    %c0_i32_1 = arith.constant 0 : i32
    return %c0_i32, %c0_i32_0 : i32, i32
  }
  func.func @transform_3(%arg0: i32, %arg1: i32) -> (i32, i32) {
    %c0_i32 = arith.constant 0 : i32
    %c0_i32_0 = arith.constant 0 : i32
    %c0_i32_1 = arith.constant 0 : i32
    return %c0_i32, %c0_i32_0 : i32, i32
  }
  func.func @transform_4(%arg0: i32, %arg1: i32) -> (i32, i32, i32, i32) {
    %c0_i32 = arith.constant 0 : i32
    %c0_i32_0 = arith.constant 0 : i32
    %c0_i32_1 = arith.constant 0 : i32
    return %arg0, %c0_i32, %arg1, %c0_i32_0 : i32, i32, i32, i32
  }
}

</mosaic_0001>

<bundles_post_ra>
// kernel: cdgnet_forward.2
= control target key start
LH: loop header
LB: loop body
LE: loop exit
PB: predicated region body
PF: predicated region fallthrough
CT: control target
= control target key end

     0   :  { %s745_s18 = smov 0   ;;  %s747_s19 = smov 0   ;;  %s831_s0 = inlined_call_operand.vmem [shape: f32[4,27,64], index: 0, kind: input, shape index: {}]   ;;  %s832_s1 = inlined_call_operand.vmem [shape: f32[32,27], index: 1, kind: input, shape index: {}]   ;;  %s833_s2 = inlined_call_operand.vmem [shape: f32[32,1], index: 2, kind: input, shape index: {}]   ;;  %s834_s3 = inlined_call_operand.vmem [shape: f32[20,32], index: 3, kind: input, shape index: {}]   ;;  %s835_s4 = inlined_call_operand.vmem [shape: f32[20,1], index: 4, kind: input, shape index: {}]   ;;  %s836_s5 = inlined_call_operand.vmem [shape: f32[4,20,64], index: 5, kind: output, shape index: {}]  }
   0x1   :  { %s749_s20 = smov 0  }
   0x2 LB: > { %s27_s21 = sadd.s32 1, %s706_s19  ;;  %p597_p0 = scmp.ge.s32.totalorder %s710_s20, 1  ;;  %s710_s20 = sphi %s749_s20, %s15_s20   ;;  %s706_s19 = sphi %s747_s19, %s838_s19   ;;  %s702_s18 = sphi %s745_s18, %s837_s18  }
   0x3   : > { %p29_p1 = scmp.ge.s32.totalorder %s27_s21, 4  ;;  %p206_p2 = scmp.lt.s32.totalorder %s710_s20, 5 }
   0x5   : > { %s840_s21 = smov (%p29_p1, %s27_s21), 0  ;;  %p207_p3 = pnand %p597_p0, %p206_p2 }
   0x6   : > { %p240_p4 = scmp.lt.s32.totalorder (!%p207_p3), %s702_s18, 3 }
   0x7   : > { %210 = sbr.rel (%p207_p3) target bundleno = 436 (0x1b4), region = 40 }
   0xc   : > { %v260_v0 = vld [vmem:[%s832_s1] sm:$0xff]  ;;  %vm288_vm0 = vcmask 220160   ;;  %v267_v1 = vld [vmem:[%s833_s2 + $0x18] sm:$0xff]  ;;  %s842_s18 = smov (!%p240_p4, %s702_s18), 3  ;;  %v712_v2 = vmov 0   ;;  %v265_v3 = vld [vmem:[%s833_s2 + $0x8] sm:$0xff] }
   0xd   : > { %635 = vmatprep.mubr.msk.f32.mxu0 %vm288_vm0, %v260_v0  ;;  %686 = vset.pattern.permute.xlu0 %v712_v2  ;;  %s611_s28 = sshll.u32 %s842_s18, 5  ;;  %vm301_vm1 = vcmask 1042432   ;;  %v266_v4 = vld [vmem:[%s833_s2 + $0x10] sm:$0xff]  ;;  %v264_v5 = vld [vmem:[%s833_s2] sm:$0xff]  ;;  %v398_v10 = vld [vmem:[%s835_s4 + $0x8] sm:$0xff]  ;;  %v713_v16 = vmov 0.0  }
   0xe   : > { %687 = vset.pattern.permute.xlu1 %v712_v2  ;;  %285 = vperm.xlu0 %686, %v267_v1   ;;  %s247_s8 = scalar_lea.vmem %s831_s0, %s611_s28  ;;  %v397_v9 = vld [vmem:[%s835_s4] sm:$0xff]  ;;  %v261_v12 = vld [vmem:[%s832_s1 + $0x8] sm:$0xff]  ;;  %v399_v13 = vld [vmem:[%s835_s4 + $0x10] sm:$0xf]  ;;  %vm714_vm2 = vmmov 0   ;;  %vm415_vm3 = vcmask 261120  }
   0xf   : > { %275 = vperm.xlu1 %687, %v265_v3   ;;  %v259_v6 = vld [vmem:[%s247_s8 + $0x18] sm:$0x7]  ;;  %v258_v7 = vld [vmem:[%s247_s8 + $0x10] sm:$0xff]  ;;  %v257_v8 = vld [vmem:[%s247_s8 + $0x8] sm:$0xff]  ;;  %641 = vmatprep.subr.mxu1 %v713_v16  ;;  %vm505_vm4 = vcmask 523264   ;;  %vm508_vm5 = vcmask 519168  }
  0x10   : > { %627 = vmatprep.subr.msk.mxu0 %vm301_vm1, %v259_v6  ;;  %v256_v11 = vld [vmem:[%s247_s8] sm:$0xff]  ;;  %v262_v14 = vld [vmem:[%s832_s1 + $0x10] sm:$0xff]  ;;  %v263_v15 = vld [vmem:[%s832_s1 + $0x18] sm:$0xff]  ;;  %649 = vmatprep.mubr.msk.f32.mxu1 %vm714_vm2, %v713_v16  ;;  %s658_s8 = smul.u32 24, %s842_s18 }
  0x11   : > { %628 = vmatpush3.msk.msra.mxu0 %vm301_vm1, %v259_v6  ;;  %v394_v33 = vld [vmem:[%s834_s3] sm:$0xff]  ;;  %v395_v34 = vld [vmem:[%s834_s3 + $0x8] sm:$0xff]  ;;  %v396_v35 = vld [vmem:[%s834_s3 + $0x10] sm:$0xf] }
  0x12   : > { %280 = vperm.xlu0 %686, %v266_v4   ;;  %629 = vmatprep.subr.mxu0 %v258_v7  ;;  %s255_s11 = scalar_lea.vmem %s836_s5, %s658_s8 }
  0x13   : > { %270 = vperm.xlu1 %687, %v264_v5   ;;  %630 = vmatpush3.msra.mxu0 %v258_v7 }
  0x14   : > { %631 = vmatprep.subr.mxu0 %v257_v8 }
  0x15   : > { %632 = vmatpush3.msra.mxu0 %v257_v8 }
  0x16   : > { %402 = vperm.xlu0 %686, %v397_v9   ;;  %633 = vmatprep.subr.mxu0 %v256_v11 }
  0x17   : > { %407 = vperm.xlu1 %687, %v398_v10   ;;  %634 = vmatpush3.msra.mxu0 %v256_v11 }
  0x18   : > { %636 = vmatmul.mubr.msk.f32.vlgmr.msra.gmra.mxu0 %vm288_vm0, %v261_v12 }
  0x19   : > { %638 = vmatprep.mubr.msk.f32.mxu0 %vm288_vm0, %v262_v14 }
  0x1a   : > { %412 = vperm.xlu0 %686, %v399_v13  }
  0x1c   : > { %639 = vmatmul.mubr.msk.f32.gmra.mxu0 %vm288_vm0, %v263_v15 }
  0x89   : > { %v286_v17 = vpop.permute.xlu0 %285 }
  0x8a   : > { %v276_v18 = vpop.permute.xlu1 %275 }
  0x8d   : > { %v281_v22 = vpop.permute.xlu0 %280 }
  0x8e   : > { %v271_v24 = vpop.permute.xlu1 %270 }
  0x91   : > { %v403_v36 = vpop.permute.xlu0 %402 }
  0x92   : > { %v408_v40 = vpop.permute.xlu1 %407 }
  0x95   : > { %v413_v44 = vpop.permute.xlu0 %412 }
  0xd8   : > { %v637_v19 = vpop.f32.mrf.mxu0 }
  0xd9   : > { %v377_v26 = vadd.f32 %v637_v19, %v276_v18 }
  0xda   : > { %v371_v20 = vpop.f32.mrf.mxu0 }
  0xdb   : > { %v372_v29 = vadd.f32 %v371_v20, %v271_v24  ;;  %v391_v31 = vmax.f32 %v377_v26, 0.0 }
  0xdc   : > { %v640_v21 = vpop.f32.mrf.mxu0 }
  0xdd   : > { %v387_v23 = vadd.f32 %v640_v21, %v286_v17  ;;  %v390_v32 = vmax.f32 %v372_v29, 0.0 }
  0xde   : > { %v381_v25 = vpop.f32.mrf.mxu0 }
  0xdf   : > { %v393_v27 = vmax.f32 %v387_v23, 0.0  ;;  %v382_v28 = vadd.f32 %v381_v25, %v281_v22 }
  0xe1   : > { %v392_v30 = vmax.f32 %v382_v28, 0.0  ;;  %642 = vmatpush3.msra.mxu1 %v393_v27 }
  0xe2   : > { %643 = vmatprep.subr.mxu1 %v713_v16 }
  0xe3   : > { %644 = vmatpush3.msra.mxu1 %v392_v30 }
  0xe4   : > { %645 = vmatprep.subr.mxu1 %v713_v16 }
  0xe5   : > { %646 = vmatpush3.msra.mxu1 %v391_v31 }
  0xe6   : > { %647 = vmatprep.subr.mxu1 %v713_v16 }
  0xe7   : > { %648 = vmatpush3.msra.mxu1 %v390_v32 }
  0xe8   : > { %650 = vmatmul.mubr.msk.f32.vlgmr.msra.gmra.mxu1 %vm415_vm3, %v394_v33 }
  0xe9   : > { %652 = vmatprep.mubr.msk.f32.mxu1 %vm714_vm2, %v713_v16 }
  0xec   : > { %653 = vmatmul.mubr.msk.f32.gmra.mxu1 %vm415_vm3, %v395_v34 }
  0xed   : > { %655 = vmatprep.mubr.msk.f32.mxu1 %vm714_vm2, %v713_v16 }
  0xf0   : > { %656 = vmatmul.mubr.msk.f32.gmra.mxu1 %vm415_vm3, %v396_v35 }
 0x1a8   : > { %v491_v37 = vpop.f32.mrf.mxu1 }
 0x1a9   : > { %v492_v38 = vadd.f32 %v491_v37, %v403_v36 }
 0x1aa   : > { %v651_v39 = vpop.f32.mrf.mxu1 }
 0x1ab   : > { %506 = vst.msk [vmem:[%s255_s11] sm:$0xff] %vm505_vm4, %v492_v38 }
 0x1ac   : > { %v496_v41 = vpop.f32.mrf.mxu1 }
 0x1ad   : > { %v497_v42 = vadd.f32 %v496_v41, %v408_v40 }
 0x1ae   : > { %v654_v43 = vpop.f32.mrf.mxu1 }
 0x1af   : > { %507 = vst.msk [vmem:[%s255_s11 + $0x8] sm:$0xff] %vm505_vm4, %v497_v42 }
 0x1b0   : > { %v501_v45 = vpop.f32.mrf.mxu1 }
 0x1b1   : > { %v502_v46 = vadd.f32 %v501_v45, %v413_v44 }
 0x1b2   : > { %v657_v47 = vpop.f32.mrf.mxu1 }
 0x1b3   : > { %509 = vst.msk [vmem:[%s255_s11 + $0x10] sm:$0xf] %vm508_vm5, %v502_v46 }
 0x1b4 PF: > { %s15_s20 = sadd.s32 1, %s710_s20   ;;  %s837_s18 = smov %s706_s19 }
 0x1b5   : > { %p12_p5 = scmp.ge.s32.totalorder %s15_s20, 6   ;;  %s838_s19 = smov %s840_s21 }
 0x1b7   :  { %14 = sbr.rel (!%p12_p5) target bundleno = 2 (0x2), region = 70 }

// kernel: cdgnet_forward.3
= control target key start
LH: loop header
LB: loop body
LE: loop exit
PB: predicated region body
PF: predicated region fallthrough
CT: control target
= control target key end

     0   :  { %s5437_s15 = smov 0   ;;  %s5439_s16 = smov 0   ;;  %s5878_s0 = inlined_call_operand.vmem [shape: f32[4,20,8,8], index: 0, kind: input, shape index: {}]   ;;  %s5879_s1 = inlined_call_operand.vmem [shape: f32[16,8], index: 1, kind: input, shape index: {}]   ;;  %s5880_s2 = inlined_call_operand.vmem [shape: f32[8,16], index: 2, kind: input, shape index: {}]   ;;  %s5881_s3 = inlined_call_operand.vmem [shape: f32[8,16], index: 3, kind: input, shape index: {}]   ;;  %s5882_s4 = inlined_call_operand.vmem [shape: f32[4,20,16,16], index: 4, kind: output, shape index: {}]  }
   0x1   :  { %s5441_s17 = smov 0  }
   0x2 LB: > { %s26_s18 = sadd.s32 1, %s5404_s16  ;;  %p4795_p0 = scmp.ge.s32.totalorder %s5408_s17, 1  ;;  %s5408_s17 = sphi %s5441_s17, %s14_s17   ;;  %s5404_s16 = sphi %s5439_s16, %s5884_s16   ;;  %s5400_s15 = sphi %s5437_s15, %s5883_s15  }
   0x3   : > { %p28_p1 = scmp.ge.s32.totalorder %s26_s18, 4  ;;  %p187_p2 = scmp.lt.s32.totalorder %s5408_s17, 5 }
   0x5   : > { %s5886_s18 = smov (%p28_p1, %s26_s18), 0  ;;  %p188_p3 = pnand %p4795_p0, %p187_p2 }
   0x6   : > { %p222_p4 = scmp.lt.s32.totalorder (!%p188_p3), %s5400_s15, 3 }
   0x7   : > { %191 = sbr.rel (%p188_p3) target bundleno = 4229 (0x1085), region = 36 }
   0xc   : > { %v5458_v0 = vld [vmem:[%s5881_s3] sm:$0xff]  ;;  %v5410_v2 = vmov 0.0   ;;  %vm5411_vm0 = vmmov 0   ;;  %s5888_s15 = smov (!%p222_p4, %s5400_s15), 3  ;;  %vm267_vm1 = vcmask 64512   ;;  %v5502_v11 = vld [vmem:[%s5879_s1 + $0x8] sm:$0xff] }
   0xd   : > { %v5463_v1 = vld [vmem:[%s5880_s2] sm:$0xff]  ;;  %5058 = vmatprep.subr.mxu0 %v5410_v2  ;;  %5063 = vmatprep.subr.mxu1 %v5410_v2  ;;  %s5358_s23 = smul.u32 160, %s5888_s15  ;;  %vm492_vm2 = vcmask 130048  }
   0xe   : > { %5059 = vmatpush3.msra.mxu0 %v5458_v0  ;;  %5060 = vmatprep.mubr.msk.f32.mxu0 %vm5411_vm0, %v5410_v2  ;;  %v5491_v4 = vld [vmem:[%s5879_s1] sm:$0xff]  ;;  %s5359_s5 = smul.u32 320, %s5888_s15 }
   0xf   : > { %5064 = vmatpush3.msra.mxu1 %v5463_v1  ;;  %5065 = vmatprep.mubr.msk.f32.mxu1 %vm5411_vm0, %v5410_v2  ;;  %s5480_s26 = scalar_lea.vmem %s5878_s0, %s5358_s23 }
  0x10   : > { %5073 = vmatprep.subr.mxu1 %v5410_v2  ;;  %v243_v3 = vld [vmem:[%s5480_s26] sm:$0xff]  ;;  %v244_v5 = vld [vmem:[%s5480_s26 + $0x8] sm:$0xff]  ;;  %v245_v14 = vld [vmem:[%s5480_s26 + $0x10] sm:$0xff]  ;;  %s5523_s8 = scalar_lea.vmem %s5882_s4, %s5359_s5 }
  0x11   : > { %5061 = vmatmul.mubr.msk.f32.vlgmr.msra.gmra.mxu0 %vm267_vm1, %v243_v3  ;;  %5066 = vmatmul.mubr.msk.f32.vlgmr.msra.gmra.mxu1 %vm267_vm1, %v243_v3  ;;  %v246_v22 = vld [vmem:[%s5480_s26 + $0x18] sm:$0xff]  ;;  %v247_v30 = vld [vmem:[%s5480_s26 + $0x20] sm:$0xff]  ;;  %v248_v38 = vld [vmem:[%s5480_s26 + $0x28] sm:$0xff] }
  0x12   : > { %5074 = vmatpush3.msra.mxu1 %v5458_v0  ;;  %5075 = vmatprep.mubr.msk.f32.mxu1 %vm5411_vm0, %v5410_v2  ;;  %v249_v46 = vld [vmem:[%s5480_s26 + $0x30] sm:$0xff]  ;;  %v250_v54 = vld [vmem:[%s5480_s26 + $0x38] sm:$0xff]  ;;  %v251_v62 = vld [vmem:[%s5480_s26 + $0x40] sm:$0xff] }
  0x13   : > { %5070 = vmatprep.mubr.msk.f32.mxu0 %vm267_vm1, %v5491_v4 }
  0x15   : > { %5076 = vmatmul.mubr.msk.f32.vlgmr.msra.gmra.mxu1 %vm267_vm1, %v244_v5 }
  0x16   : > { %5085 = vmatprep.mubr.msk.f32.mxu1 %vm267_vm1, %v5491_v4 }
  0xd1   : > { %v337_v6 = vpop.f32.mrf.mxu0  ;;  %v407_v7 = vpop.f32.mrf.mxu1 }
  0xd2   : > { %v408_v8 = vadd.f32 %v407_v7, %v337_v6 }
  0xd3   : > { %v5062_v9 = vpop.f32.mrf.mxu0  ;;  %v5067_v10 = vpop.f32.mrf.mxu1 }
  0xd4   : > { %5068 = vmatprep.subr.mxu0 %v408_v8  ;;  %v252_v10 = vld [vmem:[%s5480_s26 + $0x48] sm:$0xff] }
  0xd5   : > { %5069 = vmatpush3.msra.mxu0 %v408_v8  ;;  %v564_v12 = vpop.f32.mrf.mxu1 }
  0xd6   : > { %5071 = vmatmul.mubr.msk.f32.vlgmr.msra.gmra.mxu0 %vm267_vm1, %v5502_v11  ;;  %5078 = vmatprep.subr.mxu0 %v5410_v2 }
  0xd7   : > { %5079 = vmatpush3.msra.mxu0 %v5463_v1  ;;  %5080 = vmatprep.mubr.msk.f32.mxu0 %vm5411_vm0, %v5410_v2  ;;  %v5077_v13 = vpop.f32.mrf.mxu1 }
  0xd8   : > { %5088 = vmatprep.subr.mxu0 %v5410_v2 }
  0xda   : > { %5081 = vmatmul.mubr.msk.f32.vlgmr.msra.gmra.mxu0 %vm267_vm1, %v244_v5 }
  0xdb   : > { %5089 = vmatpush3.msra.mxu0 %v5458_v0  ;;  %5090 = vmatprep.mubr.msk.f32.mxu0 %vm5411_vm0, %v5410_v2 }
  0xde   : > { %5091 = vmatmul.mubr.msk.f32.vlgmr.msra.gmra.mxu0 %vm267_vm1, %v245_v14 }
  0xdf   : > { %5100 = vmatprep.mubr.msk.f32.mxu0 %vm267_vm1, %v5491_v4 }
 0x196   : > { %v5072_v15 = vpop.f32.mrf.mxu0 }
 0x197   : > { %494 = vst.msk [vmem:[%s5523_s8 + $0x8] sm:$0xff] %vm492_vm2, %v5072_v15 }
 0x198   : > { %v483_v16 = vpop.f32.mrf.mxu0 }
 0x199   : > { %493 = vst.msk [vmem:[%s5523_s8] sm:$0xff] %vm492_vm2, %v483_v16 }
 0x19a   : > { %v634_v17 = vpop.f32.mrf.mxu0 }
 0x19b   : > { %v635_v18 = vadd.f32 %v634_v17, %v564_v12 }
 0x19c   : > { %v5082_v19 = vpop.f32.mrf.mxu0 }
 0x19d   : > { %5083 = vmatprep.subr.mxu1 %v635_v18  ;;  %v253_v19 = vld [vmem:[%s5480_s26 + $0x50] sm:$0xff] }
 0x19e   : > { %5084 = vmatpush3.msra.mxu1 %v635_v18  ;;  %v785_v20 = vpop.f32.mrf.mxu0 }
 0x19f   : > { %5086 = vmatmul.mubr.msk.f32.vlgmr.msra.gmra.mxu1 %vm267_vm1, %v5502_v11  ;;  %5093 = vmatprep.subr.mxu1 %v5410_v2 }
 0x1a0   : > { %5094 = vmatpush3.msra.mxu1 %v5463_v1  ;;  %5095 = vmatprep.mubr.msk.f32.mxu1 %vm5411_vm0, %v5410_v2  ;;  %v5092_v21 = vpop.f32.mrf.mxu0 }
 0x1a1   : > { %5103 = vmatprep.subr.mxu1 %v5410_v2 }
 0x1a3   : > { %5096 = vmatmul.mubr.msk.f32.vlgmr.msra.gmra.mxu1 %vm267_vm1, %v245_v14 }
 0x1a4   : > { %5104 = vmatpush3.msra.mxu1 %v5458_v0  ;;  %5105 = vmatprep.mubr.msk.f32.mxu1 %vm5411_vm0, %v5410_v2 }
 0x1a7   : > { %5106 = vmatmul.mubr.msk.f32.vlgmr.msra.gmra.mxu1 %vm267_vm1, %v246_v22 }
 0x1a8   : > { %5115 = vmatprep.mubr.msk.f32.mxu1 %vm267_vm1, %v5491_v4 }
 0x25f   : > { %v5087_v23 = vpop.f32.mrf.mxu1 }
 0x260   : > { %4807 = vst.msk [vmem:[%s5523_s8 + $0x18] sm:$0xff] %vm492_vm2, %v5087_v23 }
 0x261   : > { %v704_v24 = vpop.f32.mrf.mxu1 }
 0x262   : > { %4806 = vst.msk [vmem:[%s5523_s8 + $0x10] sm:$0xff] %vm492_vm2, %v704_v24 }
 0x263   : > { %v855_v25 = vpop.f32.mrf.mxu1 }
 0x264   : > { %v856_v26 = vadd.f32 %v855_v25, %v785_v20 }
 0x265   : > { %v5097_v27 = vpop.f32.mrf.mxu1 }
 0x266   : > { %5098 = vmatprep.subr.mxu0 %v856_v26  ;;  %v254_v27 = vld [vmem:[%s5480_s26 + $0x58] sm:$0xff] }
 0x267   : > { %5099 = vmatpush3.msra.mxu0 %v856_v26  ;;  %v1006_v28 = vpop.f32.mrf.mxu1 }
 0x268   : > { %5101 = vmatmul.mubr.msk.f32.vlgmr.msra.gmra.mxu0 %vm267_vm1, %v5502_v11  ;;  %5108 = vmatprep.subr.mxu0 %v5410_v2 }
 0x269   : > { %5109 = vmatpush3.msra.mxu0 %v5463_v1  ;;  %5110 = vmatprep.mubr.msk.f32.mxu0 %vm5411_vm0, %v5410_v2  ;;  %v5107_v29 = vpop.f32.mrf.mxu1 }
 0x26a   : > { %5118 = vmatprep.subr.mxu0 %v5410_v2 }
 0x26c   : > { %5111 = vmatmul.mubr.msk.f32.vlgmr.msra.gmra.mxu0 %vm267_vm1, %v246_v22 }
 0x26d   : > { %5119 = vmatpush3.msra.mxu0 %v5458_v0  ;;  %5120 = vmatprep.mubr.msk.f32.mxu0 %vm5411_vm0, %v5410_v2 }
 0x270   : > { %5121 = vmatmul.mubr.msk.f32.vlgmr.msra.gmra.mxu0 %vm267_vm1, %v247_v30 }
 0x271   : > { %5130 = vmatprep.mubr.msk.f32.mxu0 %vm267_vm1, %v5491_v4 }
 0x328   : > { %v5102_v31 = vpop.f32.mrf.mxu0 }
 0x329   : > { %4813 = vst.msk [vmem:[%s5523_s8 + $0x28] sm:$0xff] %vm492_vm2, %v5102_v31 }
 0x32a   : > { %v925_v32 = vpop.f32.mrf.mxu0 }
 0x32b   : > { %4812 = vst.msk [vmem:[%s5523_s8 + $0x20] sm:$0xff] %vm492_vm2, %v925_v32 }
 0x32c   : > { %v1076_v33 = vpop.f32.mrf.mxu0 }
 0x32d   : > { %v1077_v34 = vadd.f32 %v1076_v33, %v1006_v28 }
 0x32e   : > { %v5112_v35 = vpop.f32.mrf.mxu0 }
 0x32f   : > { %5113 = vmatprep.subr.mxu1 %v1077_v34  ;;  %v255_v35 = vld [vmem:[%s5480_s26 + $0x60] sm:$0xff] }
 0x330   : > { %5114 = vmatpush3.msra.mxu1 %v1077_v34  ;;  %v1227_v36 = vpop.f32.mrf.mxu0 }
 0x331   : > { %5116 = vmatmul.mubr.msk.f32.vlgmr.msra.gmra.mxu1 %vm267_vm1, %v5502_v11  ;;  %5123 = vmatprep.subr.mxu1 %v5410_v2 }
 0x332   : > { %5124 = vmatpush3.msra.mxu1 %v5463_v1  ;;  %5125 = vmatprep.mubr.msk.f32.mxu1 %vm5411_vm0, %v5410_v2  ;;  %v5122_v37 = vpop.f32.mrf.mxu0 }
 0x333   : > { %5133 = vmatprep.subr.mxu1 %v5410_v2 }
 0x335   : > { %5126 = vmatmul.mubr.msk.f32.vlgmr.msra.gmra.mxu1 %vm267_vm1, %v247_v30 }
 0x336   : > { %5134 = vmatpush3.msra.mxu1 %v5458_v0  ;;  %5135 = vmatprep.mubr.msk.f32.mxu1 %vm5411_vm0, %v5410_v2 }
 0x339   : > { %5136 = vmatmul.mubr.msk.f32.vlgmr.msra.gmra.mxu1 %vm267_vm1, %v248_v38 }
 0x33a   : > { %5145 = vmatprep.mubr.msk.f32.mxu1 %vm267_vm1, %v5491_v4 }
 0x3f1   : > { %v5117_v39 = vpop.f32.mrf.mxu1 }
 0x3f2   : > { %4819 = vst.msk [vmem:[%s5523_s8 + $0x38] sm:$0xff] %vm492_vm2, %v5117_v39 }
 0x3f3   : > { %v1146_v40 = vpop.f32.mrf.mxu1 }
 0x3f4   : > { %4818 = vst.msk [vmem:[%s5523_s8 + $0x30] sm:$0xff] %vm492_vm2, %v1146_v40 }
 0x3f5   : > { %v1297_v41 = vpop.f32.mrf.mxu1 }
 0x3f6   : > { %v1298_v42 = vadd.f32 %v1297_v41, %v1227_v36 }
 0x3f7   : > { %v5127_v43 = vpop.f32.mrf.mxu1 }
 0x3f8   : > { %5128 = vmatprep.subr.mxu0 %v1298_v42  ;;  %v256_v43 = vld [vmem:[%s5480_s26 + $0x68] sm:$0xff] }
 0x3f9   : > { %5129 = vmatpush3.msra.mxu0 %v1298_v42  ;;  %v1448_v44 = vpop.f32.mrf.mxu1 }
 0x3fa   : > { %5131 = vmatmul.mubr.msk.f32.vlgmr.msra.gmra.mxu0 %vm267_vm1, %v5502_v11  ;;  %5138 = vmatprep.subr.mxu0 %v5410_v2 }
 0x3fb   : > { %5139 = vmatpush3.msra.mxu0 %v5463_v1  ;;  %5140 = vmatprep.mubr.msk.f32.mxu0 %vm5411_vm0, %v5410_v2  ;;  %v5137_v45 = vpop.f32.mrf.mxu1 }
 0x3fc   : > { %5148 = vmatprep.subr.mxu0 %v5410_v2 }
 0x3fe   : > { %5141 = vmatmul.mubr.msk.f32.vlgmr.msra.gmra.mxu0 %vm267_vm1, %v248_v38 }
 0x3ff   : > { %5149 = vmatpush3.msra.mxu0 %v5458_v0  ;;  %5150 = vmatprep.mubr.msk.f32.mxu0 %vm5411_vm0, %v5410_v2 }
 0x402   : > { %5151 = vmatmul.mubr.msk.f32.vlgmr.msra.gmra.mxu0 %vm267_vm1, %v249_v46 }
 0x403   : > { %5160 = vmatprep.mubr.msk.f32.mxu0 %vm267_vm1, %v5491_v4 }
 0x4ba   : > { %v5132_v47 = vpop.f32.mrf.mxu0 }
 0x4bb   : > { %4825 = vst.msk [vmem:[%s5523_s8 + $0x48] sm:$0xff] %vm492_vm2, %v5132_v47 }
 0x4bc   : > { %v1367_v48 = vpop.f32.mrf.mxu0 }
 0x4bd   : > { %4824 = vst.msk [vmem:[%s5523_s8 + $0x40] sm:$0xff] %vm492_vm2, %v1367_v48 }
 0x4be   : > { %v1518_v49 = vpop.f32.mrf.mxu0 }
 0x4bf   : > { %v1519_v50 = vadd.f32 %v1518_v49, %v1448_v44 }
 0x4c0   : > { %v5142_v51 = vpop.f32.mrf.mxu0 }
 0x4c1   : > { %5143 = vmatprep.subr.mxu1 %v1519_v50  ;;  %v258_v51 = vld [vmem:[%s5480_s26 + $0x78] sm:$0xff] }
 0x4c2   : > { %5144 = vmatpush3.msra.mxu1 %v1519_v50  ;;  %v1669_v52 = vpop.f32.mrf.mxu0 }
 0x4c3   : > { %5146 = vmatmul.mubr.msk.f32.vlgmr.msra.gmra.mxu1 %vm267_vm1, %v5502_v11  ;;  %5153 = vmatprep.subr.mxu1 %v5410_v2 }
 0x4c4   : > { %5154 = vmatpush3.msra.mxu1 %v5463_v1  ;;  %5155 = vmatprep.mubr.msk.f32.mxu1 %vm5411_vm0, %v5410_v2  ;;  %v5152_v53 = vpop.f32.mrf.mxu0 }
 0x4c5   : > { %5163 = vmatprep.subr.mxu1 %v5410_v2 }
 0x4c7   : > { %5156 = vmatmul.mubr.msk.f32.vlgmr.msra.gmra.mxu1 %vm267_vm1, %v249_v46 }
 0x4c8   : > { %5164 = vmatpush3.msra.mxu1 %v5458_v0  ;;  %5165 = vmatprep.mubr.msk.f32.mxu1 %vm5411_vm0, %v5410_v2 }
 0x4cb   : > { %5166 = vmatmul.mubr.msk.f32.vlgmr.msra.gmra.mxu1 %vm267_vm1, %v250_v54 }
 0x4cc   : > { %5175 = vmatprep.mubr.msk.f32.mxu1 %vm267_vm1, %v5491_v4 }
 0x583   : > { %v5147_v55 = vpop.f32.mrf.mxu1 }
 0x584   : > { %4831 = vst.msk [vmem:[%s5523_s8 + $0x58] sm:$0xff] %vm492_vm2, %v5147_v55 }
 0x585   : > { %v1588_v56 = vpop.f32.mrf.mxu1 }
 0x586   : > { %4830 = vst.msk [vmem:[%s5523_s8 + $0x50] sm:$0xff] %vm492_vm2, %v1588_v56 }
 0x587   : > { %v1739_v57 = vpop.f32.mrf.mxu1 }
 0x588   : > { %v1740_v58 = vadd.f32 %v1739_v57, %v1669_v52  ;;  %v257_v57 = vld [vmem:[%s5480_s26 + $0x70] sm:$0xff] }
 0x589   : > { %v5157_v59 = vpop.f32.mrf.mxu1 }
 0x58a   : > { %5158 = vmatprep.subr.mxu0 %v1740_v58 }
 0x58b   : > { %5159 = vmatpush3.msra.mxu0 %v1740_v58  ;;  %v1890_v60 = vpop.f32.mrf.mxu1 }
 0x58c   : > { %5161 = vmatmul.mubr.msk.f32.vlgmr.msra.gmra.mxu0 %vm267_vm1, %v5502_v11  ;;  %5168 = vmatprep.subr.mxu0 %v5410_v2 }
 0x58d   : > { %5169 = vmatpush3.msra.mxu0 %v5463_v1  ;;  %5170 = vmatprep.mubr.msk.f32.mxu0 %vm5411_vm0, %v5410_v2  ;;  %v5167_v61 = vpop.f32.mrf.mxu1 }
 0x58e   : > { %5178 = vmatprep.subr.mxu0 %v5410_v2 }
 0x590   : > { %5171 = vmatmul.mubr.msk.f32.vlgmr.msra.gmra.mxu0 %vm267_vm1, %v250_v54 }
 0x591   : > { %5179 = vmatpush3.msra.mxu0 %v5458_v0  ;;  %5180 = vmatprep.mubr.msk.f32.mxu0 %vm5411_vm0, %v5410_v2 }
 0x594   : > { %5181 = vmatmul.mubr.msk.f32.vlgmr.msra.gmra.mxu0 %vm267_vm1, %v251_v62 }
 0x595   : > { %5190 = vmatprep.mubr.msk.f32.mxu0 %vm267_vm1, %v5491_v4 }
 0x64c   : > { %v5162_v63 = vpop.f32.mrf.mxu0 }
 0x64d   : > { %4837 = vst.msk [vmem:[%s5523_s8 + $0x68] sm:$0xff] %vm492_vm2, %v5162_v63 }
 0x64e   : > { %v1809_v3 = vpop.f32.mrf.mxu0 }
 0x64f   : > { %4836 = vst.msk [vmem:[%s5523_s8 + $0x60] sm:$0xff] %vm492_vm2, %v1809_v3 }
 0x650   : > { %v1960_v5 = vpop.f32.mrf.mxu0 }
 0x651   : > { %v1961_v6 = vadd.f32 %v1960_v5, %v1890_v60 }
 0x652   : > { %v5172_v7 = vpop.f32.mrf.mxu0 }
 0x653   : > { %5173 = vmatprep.subr.mxu1 %v1961_v6  ;;  %v260_v7 = vld [vmem:[%s5480_s26 + $0x88] sm:$0xff] }
 0x654   : > { %5174 = vmatpush3.msra.mxu1 %v1961_v6  ;;  %v2111_v8 = vpop.f32.mrf.mxu0 }
 0x655   : > { %5176 = vmatmul.mubr.msk.f32.vlgmr.msra.gmra.mxu1 %vm267_vm1, %v5502_v11  ;;  %5183 = vmatprep.subr.mxu1 %v5410_v2 }
 0x656   : > { %5184 = vmatpush3.msra.mxu1 %v5463_v1  ;;  %5185 = vmatprep.mubr.msk.f32.mxu1 %vm5411_vm0, %v5410_v2  ;;  %v5182_v9 = vpop.f32.mrf.mxu0 }
 0x657   : > { %5193 = vmatprep.subr.mxu1 %v5410_v2 }
 0x659   : > { %5186 = vmatmul.mubr.msk.f32.vlgmr.msra.gmra.mxu1 %vm267_vm1, %v251_v62 }
 0x65a   : > { %5194 = vmatpush3.msra.mxu1 %v5458_v0  ;;  %5195 = vmatprep.mubr.msk.f32.mxu1 %vm5411_vm0, %v5410_v2 }
 0x65d   : > { %5196 = vmatmul.mubr.msk.f32.vlgmr.msra.gmra.mxu1 %vm267_vm1, %v252_v10 }
 0x65e   : > { %5205 = vmatprep.mubr.msk.f32.mxu1 %vm267_vm1, %v5491_v4 }
 0x715   : > { %v5177_v12 = vpop.f32.mrf.mxu1 }
 0x716   : > { %4843 = vst.msk [vmem:[%s5523_s8 + $0x78] sm:$0xff] %vm492_vm2, %v5177_v12 }
 0x717   : > { %v2030_v13 = vpop.f32.mrf.mxu1 }
 0x718   : > { %4842 = vst.msk [vmem:[%s5523_s8 + $0x70] sm:$0xff] %vm492_vm2, %v2030_v13 }
 0x719   : > { %v2181_v14 = vpop.f32.mrf.mxu1 }
 0x71a   : > { %v2182_v15 = vadd.f32 %v2181_v14, %v2111_v8  ;;  %v259_v14 = vld [vmem:[%s5480_s26 + $0x80] sm:$0xff] }
 0x71b   : > { %v5187_v16 = vpop.f32.mrf.mxu1 }
 0x71c   : > { %5188 = vmatprep.subr.mxu0 %v2182_v15 }
 0x71d   : > { %5189 = vmatpush3.msra.mxu0 %v2182_v15  ;;  %v2332_v17 = vpop.f32.mrf.mxu1 }
 0x71e   : > { %5191 = vmatmul.mubr.msk.f32.vlgmr.msra.gmra.mxu0 %vm267_vm1, %v5502_v11  ;;  %5198 = vmatprep.subr.mxu0 %v5410_v2 }
 0x71f   : > { %5199 = vmatpush3.msra.mxu0 %v5463_v1  ;;  %5200 = vmatprep.mubr.msk.f32.mxu0 %vm5411_vm0, %v5410_v2  ;;  %v5197_v18 = vpop.f32.mrf.mxu1 }
 0x720   : > { %5208 = vmatprep.subr.mxu0 %v5410_v2 }
 0x722   : > { %5201 = vmatmul.mubr.msk.f32.vlgmr.msra.gmra.mxu0 %vm267_vm1, %v252_v10 }
 0x723   : > { %5209 = vmatpush3.msra.mxu0 %v5458_v0  ;;  %5210 = vmatprep.mubr.msk.f32.mxu0 %vm5411_vm0, %v5410_v2 }
 0x726   : > { %5211 = vmatmul.mubr.msk.f32.vlgmr.msra.gmra.mxu0 %vm267_vm1, %v253_v19 }
 0x727   : > { %5220 = vmatprep.mubr.msk.f32.mxu0 %vm267_vm1, %v5491_v4 }
 0x7de   : > { %v5192_v20 = vpop.f32.mrf.mxu0 }
 0x7df   : > { %4849 = vst.msk [vmem:[%s5523_s8 + $0x88] sm:$0xff] %vm492_vm2, %v5192_v20 }
 0x7e0   : > { %v2251_v21 = vpop.f32.mrf.mxu0 }
 0x7e1   : > { %4848 = vst.msk [vmem:[%s5523_s8 + $0x80] sm:$0xff] %vm492_vm2, %v2251_v21 }
 0x7e2   : > { %v2402_v22 = vpop.f32.mrf.mxu0 }
 0x7e3   : > { %v2403_v23 = vadd.f32 %v2402_v22, %v2332_v17 }
 0x7e4   : > { %v5202_v24 = vpop.f32.mrf.mxu0 }
 0x7e5   : > { %5203 = vmatprep.subr.mxu1 %v2403_v23  ;;  %v262_v24 = vld [vmem:[%s5480_s26 + $0x98] sm:$0xff] }
 0x7e6   : > { %5204 = vmatpush3.msra.mxu1 %v2403_v23  ;;  %v2553_v25 = vpop.f32.mrf.mxu0 }
 0x7e7   : > { %5206 = vmatmul.mubr.msk.f32.vlgmr.msra.gmra.mxu1 %vm267_vm1, %v5502_v11  ;;  %5213 = vmatprep.subr.mxu1 %v5410_v2 }
 0x7e8   : > { %5214 = vmatpush3.msra.mxu1 %v5463_v1  ;;  %5215 = vmatprep.mubr.msk.f32.mxu1 %vm5411_vm0, %v5410_v2  ;;  %v5212_v26 = vpop.f32.mrf.mxu0 }
 0x7e9   : > { %5223 = vmatprep.subr.mxu1 %v5410_v2 }
 0x7eb   : > { %5216 = vmatmul.mubr.msk.f32.vlgmr.msra.gmra.mxu1 %vm267_vm1, %v253_v19 }
 0x7ec   : > { %5224 = vmatpush3.msra.mxu1 %v5458_v0  ;;  %5225 = vmatprep.mubr.msk.f32.mxu1 %vm5411_vm0, %v5410_v2 }
 0x7ef   : > { %5226 = vmatmul.mubr.msk.f32.vlgmr.msra.gmra.mxu1 %vm267_vm1, %v254_v27 }
 0x7f0   : > { %5235 = vmatprep.mubr.msk.f32.mxu1 %vm267_vm1, %v5491_v4 }
 0x8a7   : > { %v5207_v28 = vpop.f32.mrf.mxu1 }
 0x8a8   : > { %4855 = vst.msk [vmem:[%s5523_s8 + $0x98] sm:$0xff] %vm492_vm2, %v5207_v28 }
 0x8a9   : > { %v2472_v29 = vpop.f32.mrf.mxu1 }
 0x8aa   : > { %4854 = vst.msk [vmem:[%s5523_s8 + $0x90] sm:$0xff] %vm492_vm2, %v2472_v29 }
 0x8ab   : > { %v2623_v30 = vpop.f32.mrf.mxu1 }
 0x8ac   : > { %v2624_v31 = vadd.f32 %v2623_v30, %v2553_v25  ;;  %v261_v30 = vld [vmem:[%s5480_s26 + $0x90] sm:$0xff] }
 0x8ad   : > { %v5217_v32 = vpop.f32.mrf.mxu1 }
 0x8ae   : > { %5218 = vmatprep.subr.mxu0 %v2624_v31 }
 0x8af   : > { %5219 = vmatpush3.msra.mxu0 %v2624_v31  ;;  %v2774_v33 = vpop.f32.mrf.mxu1 }
 0x8b0   : > { %5221 = vmatmul.mubr.msk.f32.vlgmr.msra.gmra.mxu0 %vm267_vm1, %v5502_v11  ;;  %5228 = vmatprep.subr.mxu0 %v5410_v2 }
 0x8b1   : > { %5229 = vmatpush3.msra.mxu0 %v5463_v1  ;;  %5230 = vmatprep.mubr.msk.f32.mxu0 %vm5411_vm0, %v5410_v2  ;;  %v5227_v34 = vpop.f32.mrf.mxu1 }
 0x8b2   : > { %5238 = vmatprep.subr.mxu0 %v5410_v2 }
 0x8b4   : > { %5231 = vmatmul.mubr.msk.f32.vlgmr.msra.gmra.mxu0 %vm267_vm1, %v254_v27 }
 0x8b5   : > { %5239 = vmatpush3.msra.mxu0 %v5458_v0  ;;  %5240 = vmatprep.mubr.msk.f32.mxu0 %vm5411_vm0, %v5410_v2 }
 0x8b8   : > { %5241 = vmatmul.mubr.msk.f32.vlgmr.msra.gmra.mxu0 %vm267_vm1, %v255_v35 }
 0x8b9   : > { %5250 = vmatprep.mubr.msk.f32.mxu0 %vm267_vm1, %v5491_v4 }
 0x970   : > { %v5222_v36 = vpop.f32.mrf.mxu0 }
 0x971   : > { %4861 = vst.msk [vmem:[%s5523_s8 + $0xa8] sm:$0xff] %vm492_vm2, %v5222_v36 }
 0x972   : > { %v2693_v37 = vpop.f32.mrf.mxu0 }
 0x973   : > { %4860 = vst.msk [vmem:[%s5523_s8 + $0xa0] sm:$0xff] %vm492_vm2, %v2693_v37 }
 0x974   : > { %v2844_v38 = vpop.f32.mrf.mxu0 }
 0x975   : > { %v2845_v39 = vadd.f32 %v2844_v38, %v2774_v33 }
 0x976   : > { %v5232_v40 = vpop.f32.mrf.mxu0 }
 0x977   : > { %5233 = vmatprep.subr.mxu1 %v2845_v39 }
 0x978   : > { %5234 = vmatpush3.msra.mxu1 %v2845_v39  ;;  %v2995_v41 = vpop.f32.mrf.mxu0 }
 0x979   : > { %5236 = vmatmul.mubr.msk.f32.vlgmr.msra.gmra.mxu1 %vm267_vm1, %v5502_v11  ;;  %5243 = vmatprep.subr.mxu1 %v5410_v2 }
 0x97a   : > { %5244 = vmatpush3.msra.mxu1 %v5463_v1  ;;  %5245 = vmatprep.mubr.msk.f32.mxu1 %vm5411_vm0, %v5410_v2  ;;  %v5242_v42 = vpop.f32.mrf.mxu0 }
 0x97b   : > { %5253 = vmatprep.subr.mxu1 %v5410_v2 }
 0x97d   : > { %5246 = vmatmul.mubr.msk.f32.vlgmr.msra.gmra.mxu1 %vm267_vm1, %v255_v35 }
 0x97e   : > { %5254 = vmatpush3.msra.mxu1 %v5458_v0  ;;  %5255 = vmatprep.mubr.msk.f32.mxu1 %vm5411_vm0, %v5410_v2 }
 0x981   : > { %5256 = vmatmul.mubr.msk.f32.vlgmr.msra.gmra.mxu1 %vm267_vm1, %v256_v43 }
 0x982   : > { %5265 = vmatprep.mubr.msk.f32.mxu1 %vm267_vm1, %v5491_v4 }
 0xa39   : > { %v5237_v44 = vpop.f32.mrf.mxu1 }
 0xa3a   : > { %4867 = vst.msk [vmem:[%s5523_s8 + $0xb8] sm:$0xff] %vm492_vm2, %v5237_v44 }
 0xa3b   : > { %v2914_v45 = vpop.f32.mrf.mxu1 }
 0xa3c   : > { %4866 = vst.msk [vmem:[%s5523_s8 + $0xb0] sm:$0xff] %vm492_vm2, %v2914_v45 }
 0xa3d   : > { %v3065_v46 = vpop.f32.mrf.mxu1 }
 0xa3e   : > { %v3066_v47 = vadd.f32 %v3065_v46, %v2995_v41 }
 0xa3f   : > { %v5247_v48 = vpop.f32.mrf.mxu1 }
 0xa40   : > { %5248 = vmatprep.subr.mxu0 %v3066_v47 }
 0xa41   : > { %5249 = vmatpush3.msra.mxu0 %v3066_v47  ;;  %v3216_v49 = vpop.f32.mrf.mxu1 }
 0xa42   : > { %5251 = vmatmul.mubr.msk.f32.vlgmr.msra.gmra.mxu0 %vm267_vm1, %v5502_v11  ;;  %5258 = vmatprep.subr.mxu0 %v5410_v2 }
 0xa43   : > { %5259 = vmatpush3.msra.mxu0 %v5463_v1  ;;  %5260 = vmatprep.mubr.msk.f32.mxu0 %vm5411_vm0, %v5410_v2  ;;  %v5257_v50 = vpop.f32.mrf.mxu1 }
 0xa44   : > { %5268 = vmatprep.subr.mxu0 %v5410_v2 }
 0xa46   : > { %5261 = vmatmul.mubr.msk.f32.vlgmr.msra.gmra.mxu0 %vm267_vm1, %v256_v43 }
 0xa47   : > { %5269 = vmatpush3.msra.mxu0 %v5458_v0  ;;  %5270 = vmatprep.mubr.msk.f32.mxu0 %vm5411_vm0, %v5410_v2 }
 0xa4a   : > { %5271 = vmatmul.mubr.msk.f32.vlgmr.msra.gmra.mxu0 %vm267_vm1, %v258_v51 }
 0xa4b   : > { %5280 = vmatprep.mubr.msk.f32.mxu0 %vm267_vm1, %v5491_v4 }
 0xb02   : > { %v5252_v52 = vpop.f32.mrf.mxu0 }
 0xb03   : > { %4873 = vst.msk [vmem:[%s5523_s8 + $0xc8] sm:$0xff] %vm492_vm2, %v5252_v52 }
 0xb04   : > { %v3135_v53 = vpop.f32.mrf.mxu0 }
 0xb05   : > { %4872 = vst.msk [vmem:[%s5523_s8 + $0xc0] sm:$0xff] %vm492_vm2, %v3135_v53 }
 0xb06   : > { %v3286_v54 = vpop.f32.mrf.mxu0 }
 0xb07   : > { %v3287_v55 = vadd.f32 %v3286_v54, %v3216_v49 }
 0xb08   : > { %v5262_v56 = vpop.f32.mrf.mxu0 }
 0xb09   : > { %5263 = vmatprep.subr.mxu1 %v3287_v55 }
 0xb0a   : > { %5264 = vmatpush3.msra.mxu1 %v3287_v55  ;;  %v3437_v58 = vpop.f32.mrf.mxu0 }
 0xb0b   : > { %5266 = vmatmul.mubr.msk.f32.vlgmr.msra.gmra.mxu1 %vm267_vm1, %v5502_v11  ;;  %5273 = vmatprep.subr.mxu1 %v5410_v2 }
 0xb0c   : > { %5274 = vmatpush3.msra.mxu1 %v5463_v1  ;;  %5275 = vmatprep.mubr.msk.f32.mxu1 %vm5411_vm0, %v5410_v2  ;;  %v5272_v59 = vpop.f32.mrf.mxu0 }
 0xb0d   : > { %5283 = vmatprep.subr.mxu1 %v5410_v2 }
 0xb0f   : > { %5276 = vmatmul.mubr.msk.f32.vlgmr.msra.gmra.mxu1 %vm267_vm1, %v257_v57 }
 0xb10   : > { %5284 = vmatpush3.msra.mxu1 %v5458_v0  ;;  %5285 = vmatprep.mubr.msk.f32.mxu1 %vm5411_vm0, %v5410_v2 }
 0xb13   : > { %5286 = vmatmul.mubr.msk.f32.vlgmr.msra.gmra.mxu1 %vm267_vm1, %v257_v57 }
 0xb14   : > { %5295 = vmatprep.mubr.msk.f32.mxu1 %vm267_vm1, %v5491_v4 }
 0xbcb   : > { %v5267_v60 = vpop.f32.mrf.mxu1 }
 0xbcc   : > { %4879 = vst.msk [vmem:[%s5523_s8 + $0xd8] sm:$0xff] %vm492_vm2, %v5267_v60 }
 0xbcd   : > { %v3356_v61 = vpop.f32.mrf.mxu1 }
 0xbce   : > { %4878 = vst.msk [vmem:[%s5523_s8 + $0xd0] sm:$0xff] %vm492_vm2, %v3356_v61 }
 0xbcf   : > { %v3510_v62 = vpop.f32.mrf.mxu1 }
 0xbd0   : > { %v3511_v63 = vadd.f32 %v3510_v62, %v3437_v58 }
 0xbd1   : > { %v5277_v3 = vpop.f32.mrf.mxu1 }
 0xbd2   : > { %5278 = vmatprep.subr.mxu0 %v3511_v63 }
 0xbd3   : > { %5279 = vmatpush3.msra.mxu0 %v3511_v63  ;;  %v3658_v5 = vpop.f32.mrf.mxu1 }
 0xbd4   : > { %5281 = vmatmul.mubr.msk.f32.vlgmr.msra.gmra.mxu0 %vm267_vm1, %v5502_v11  ;;  %5288 = vmatprep.subr.mxu0 %v5410_v2 }
 0xbd5   : > { %5289 = vmatpush3.msra.mxu0 %v5463_v1  ;;  %5290 = vmatprep.mubr.msk.f32.mxu0 %vm5411_vm0, %v5410_v2  ;;  %v5287_v6 = vpop.f32.mrf.mxu1 }
 0xbd6   : > { %5298 = vmatprep.subr.mxu0 %v5410_v2 }
 0xbd8   : > { %5291 = vmatmul.mubr.msk.f32.vlgmr.msra.gmra.mxu0 %vm267_vm1, %v258_v51 }
 0xbd9   : > { %5299 = vmatpush3.msra.mxu0 %v5458_v0  ;;  %5300 = vmatprep.mubr.msk.f32.mxu0 %vm5411_vm0, %v5410_v2 }
 0xbdc   : > { %5301 = vmatmul.mubr.msk.f32.vlgmr.msra.gmra.mxu0 %vm267_vm1, %v260_v7 }
 0xbdd   : > { %5310 = vmatprep.mubr.msk.f32.mxu0 %vm267_vm1, %v5491_v4 }
 0xc94   : > { %v5282_v8 = vpop.f32.mrf.mxu0 }
 0xc95   : > { %4885 = vst.msk [vmem:[%s5523_s8 + $0xe8] sm:$0xff] %vm492_vm2, %v5282_v8 }
 0xc96   : > { %v3580_v9 = vpop.f32.mrf.mxu0 }
 0xc97   : > { %4884 = vst.msk [vmem:[%s5523_s8 + $0xe0] sm:$0xff] %vm492_vm2, %v3580_v9 }
 0xc98   : > { %v3728_v10 = vpop.f32.mrf.mxu0 }
 0xc99   : > { %v3729_v12 = vadd.f32 %v3728_v10, %v3658_v5 }
 0xc9a   : > { %v5292_v13 = vpop.f32.mrf.mxu0 }
 0xc9b   : > { %5293 = vmatprep.subr.mxu1 %v3729_v12 }
 0xc9c   : > { %5294 = vmatpush3.msra.mxu1 %v3729_v12  ;;  %v3879_v15 = vpop.f32.mrf.mxu0 }
 0xc9d   : > { %5296 = vmatmul.mubr.msk.f32.vlgmr.msra.gmra.mxu1 %vm267_vm1, %v5502_v11  ;;  %5303 = vmatprep.subr.mxu1 %v5410_v2 }
 0xc9e   : > { %5304 = vmatpush3.msra.mxu1 %v5463_v1  ;;  %5305 = vmatprep.mubr.msk.f32.mxu1 %vm5411_vm0, %v5410_v2  ;;  %v5302_v16 = vpop.f32.mrf.mxu0 }
 0xc9f   : > { %5313 = vmatprep.subr.mxu1 %v5410_v2 }
 0xca1   : > { %5306 = vmatmul.mubr.msk.f32.vlgmr.msra.gmra.mxu1 %vm267_vm1, %v259_v14 }
 0xca2   : > { %5314 = vmatpush3.msra.mxu1 %v5458_v0  ;;  %5315 = vmatprep.mubr.msk.f32.mxu1 %vm5411_vm0, %v5410_v2 }
 0xca5   : > { %5316 = vmatmul.mubr.msk.f32.vlgmr.msra.gmra.mxu1 %vm267_vm1, %v259_v14 }
 0xca6   : > { %5325 = vmatprep.mubr.msk.f32.mxu1 %vm267_vm1, %v5491_v4 }
 0xd5d   : > { %v5297_v17 = vpop.f32.mrf.mxu1 }
 0xd5e   : > { %4891 = vst.msk [vmem:[%s5523_s8 + $0xf8] sm:$0xff] %vm492_vm2, %v5297_v17 }
 0xd5f   : > { %v3798_v18 = vpop.f32.mrf.mxu1 }
 0xd60   : > { %4890 = vst.msk [vmem:[%s5523_s8 + $0xf0] sm:$0xff] %vm492_vm2, %v3798_v18 }
 0xd61   : > { %v3952_v19 = vpop.f32.mrf.mxu1 }
 0xd62   : > { %v3953_v20 = vadd.f32 %v3952_v19, %v3879_v15 }
 0xd63   : > { %v5307_v21 = vpop.f32.mrf.mxu1 }
 0xd64   : > { %5308 = vmatprep.subr.mxu0 %v3953_v20 }
 0xd65   : > { %5309 = vmatpush3.msra.mxu0 %v3953_v20  ;;  %v4100_v22 = vpop.f32.mrf.mxu1 }
 0xd66   : > { %5311 = vmatmul.mubr.msk.f32.vlgmr.msra.gmra.mxu0 %vm267_vm1, %v5502_v11  ;;  %5318 = vmatprep.subr.mxu0 %v5410_v2 }
 0xd67   : > { %5319 = vmatpush3.msra.mxu0 %v5463_v1  ;;  %5320 = vmatprep.mubr.msk.f32.mxu0 %vm5411_vm0, %v5410_v2  ;;  %v5317_v23 = vpop.f32.mrf.mxu1 }
 0xd68   : > { %5328 = vmatprep.subr.mxu0 %v5410_v2 }
 0xd6a   : > { %5321 = vmatmul.mubr.msk.f32.vlgmr.msra.gmra.mxu0 %vm267_vm1, %v260_v7 }
 0xd6b   : > { %5329 = vmatpush3.msra.mxu0 %v5458_v0  ;;  %5330 = vmatprep.mubr.msk.f32.mxu0 %vm5411_vm0, %v5410_v2 }
 0xd6e   : > { %5331 = vmatmul.mubr.msk.f32.vlgmr.msra.gmra.mxu0 %vm267_vm1, %v262_v24 }
 0xd6f   : > { %5340 = vmatprep.mubr.msk.f32.mxu0 %vm267_vm1, %v5491_v4 }
 0xe26   : > { %v5312_v25 = vpop.f32.mrf.mxu0 }
 0xe27   : > { %4897 = vst.msk [vmem:[%s5523_s8 + $0x108] sm:$0xff] %vm492_vm2, %v5312_v25 }
 0xe28   : > { %v4022_v26 = vpop.f32.mrf.mxu0 }
 0xe29   : > { %4896 = vst.msk [vmem:[%s5523_s8 + $0x100] sm:$0xff] %vm492_vm2, %v4022_v26 }
 0xe2a   : > { %v4170_v27 = vpop.f32.mrf.mxu0 }
 0xe2b   : > { %v4171_v28 = vadd.f32 %v4170_v27, %v4100_v22 }
 0xe2c   : > { %v5322_v29 = vpop.f32.mrf.mxu0 }
 0xe2d   : > { %5323 = vmatprep.subr.mxu1 %v4171_v28 }
 0xe2e   : > { %5324 = vmatpush3.msra.mxu1 %v4171_v28  ;;  %v4321_v31 = vpop.f32.mrf.mxu0 }
 0xe2f   : > { %5326 = vmatmul.mubr.msk.f32.vlgmr.msra.gmra.mxu1 %vm267_vm1, %v5502_v11  ;;  %5333 = vmatprep.subr.mxu1 %v5410_v2 }
 0xe30   : > { %5334 = vmatpush3.msra.mxu1 %v5463_v1  ;;  %5335 = vmatprep.mubr.msk.f32.mxu1 %vm5411_vm0, %v5410_v2  ;;  %v5332_v32 = vpop.f32.mrf.mxu0 }
 0xe31   : > { %5343 = vmatprep.subr.mxu1 %v5410_v2 }
 0xe33   : > { %5336 = vmatmul.mubr.msk.f32.vlgmr.msra.gmra.mxu1 %vm267_vm1, %v261_v30 }
 0xe34   : > { %5344 = vmatpush3.msra.mxu1 %v5458_v0  ;;  %5345 = vmatprep.mubr.msk.f32.mxu1 %vm5411_vm0, %v5410_v2 }
 0xe37   : > { %5346 = vmatmul.mubr.msk.f32.vlgmr.msra.gmra.mxu1 %vm267_vm1, %v261_v30 }
 0xe38   : > { %5355 = vmatprep.mubr.msk.f32.mxu1 %vm267_vm1, %v5491_v4 }
 0xeef   : > { %v5327_v33 = vpop.f32.mrf.mxu1 }
 0xef0   : > { %4903 = vst.msk [vmem:[%s5523_s8 + $0x118] sm:$0xff] %vm492_vm2, %v5327_v33 }
 0xef1   : > { %v4240_v34 = vpop.f32.mrf.mxu1 }
 0xef2   : > { %4902 = vst.msk [vmem:[%s5523_s8 + $0x110] sm:$0xff] %vm492_vm2, %v4240_v34 }
 0xef3   : > { %v4394_v35 = vpop.f32.mrf.mxu1 }
 0xef4   : > { %v4395_v0 = vadd.f32 %v4394_v35, %v4321_v31 }
 0xef5   : > { %v5337_v36 = vpop.f32.mrf.mxu1 }
 0xef6   : > { %5338 = vmatprep.subr.mxu0 %v4395_v0 }
 0xef7   : > { %5339 = vmatpush3.msra.mxu0 %v4395_v0  ;;  %v4542_v4 = vpop.f32.mrf.mxu1 }
 0xef8   : > { %5341 = vmatmul.mubr.msk.f32.vlgmr.msra.gmra.mxu0 %vm267_vm1, %v5502_v11  ;;  %5348 = vmatprep.subr.mxu0 %v5410_v2 }
 0xef9   : > { %5349 = vmatpush3.msra.mxu0 %v5463_v1  ;;  %5350 = vmatprep.mubr.msk.f32.mxu0 %vm5411_vm0, %v5410_v2  ;;  %v5347_v37 = vpop.f32.mrf.mxu1 }
 0xefc   : > { %5351 = vmatmul.mubr.msk.f32.vlgmr.msra.gmra.mxu0 %vm267_vm1, %v262_v24 }
 0xfb8   : > { %v5342_v38 = vpop.f32.mrf.mxu0 }
 0xfb9   : > { %4909 = vst.msk [vmem:[%s5523_s8 + $0x128] sm:$0xff] %vm492_vm2, %v5342_v38 }
 0xfba   : > { %v4464_v39 = vpop.f32.mrf.mxu0 }
 0xfbb   : > { %4908 = vst.msk [vmem:[%s5523_s8 + $0x120] sm:$0xff] %vm492_vm2, %v4464_v39 }
 0xfbc   : > { %v4612_v40 = vpop.f32.mrf.mxu0 }
 0xfbd   : > { %v4613_v41 = vadd.f32 %v4612_v40, %v4542_v4 }
 0xfbe   : > { %v5352_v42 = vpop.f32.mrf.mxu0 }
 0xfbf   : > { %5353 = vmatprep.subr.mxu1 %v4613_v41 }
 0xfc0   : > { %5354 = vmatpush3.msra.mxu1 %v4613_v41 }
 0xfc1   : > { %5356 = vmatmul.mubr.msk.f32.vlgmr.msra.gmra.mxu1 %vm267_vm1, %v5502_v11 }
0x1081   : > { %v5357_v1 = vpop.f32.mrf.mxu1 }
0x1082   : > { %4915 = vst.msk [vmem:[%s5523_s8 + $0x138] sm:$0xff] %vm492_vm2, %v5357_v1 }
0x1083   : > { %v4682_v2 = vpop.f32.mrf.mxu1 }
0x1084   : > { %4914 = vst.msk [vmem:[%s5523_s8 + $0x130] sm:$0xff] %vm492_vm2, %v4682_v2 }
0x1085 PF: > { %s14_s17 = sadd.s32 1, %s5408_s17   ;;  %s5883_s15 = smov %s5404_s16 }
0x1086   : > { %p11_p5 = scmp.ge.s32.totalorder %s14_s17, 6   ;;  %s5884_s16 = smov %s5886_s18 }
0x1088   :  { %13 = sbr.rel (!%p11_p5) target bundleno = 2 (0x2), region = 88 }

</bundles_post_ra>
